<compile_context>
chip_gen: v6e
topology: v6e:2x2x1
jax: 0.10.0
libtpu: 0.0.40
codegen_flags: <defaults>
</compile_context>

<pallas_src>
import jax
import jax.numpy as jnp
import numpy as np
from jax.experimental import pallas as pl
from jax.experimental.pallas import tpu as pltpu

_BIG = 1e30  # plain Python float: folded as a literal, never a captured jnp constant


def _round_up(a, b):
    return ((a + b - 1) // b) * b


def _triplet_kernel(xq_ref, xkt_ref, sqc_ref, sqr_ref, tcol_ref, trow_ref,
                    dap_ref, dan_ref):
    j = pl.program_id(1)
    tn = xkt_ref.shape[1]

    # Output blocks are resident across the key (reduction) axis -> accumulate
    # directly in them (P3 init/finalize pattern, no scratch).
    @pl.when(j == 0)
    def _init():
        dap_ref[...] = jnp.full(dap_ref.shape, -_BIG, dap_ref.dtype)
        dan_ref[...] = jnp.full(dan_ref.shape, _BIG, dan_ref.dtype)

    # Gram tile on the MXU: (tm, d_pad) x (d_pad, tn) -> (tm, tn), f32 accumulation.
    gram = jnp.dot(xq_ref[...], xkt_ref[...], preferred_element_type=jnp.float32)

    # Slice the current key window out of the VMEM-resident row metadata.
    start = pl.multiple_of(j * tn, tn)
    sqr = sqr_ref[:, pl.ds(start, tn)]     # (1, tn) f32; padded tail is +_BIG
    trow = trow_ref[:, pl.ds(start, tn)]   # (1, tn) int32; padded tail is a sentinel

    # Partial squared distance: ||xk||^2 - 2<xq, xk>.  (||xq||^2 added at finalize.)
    d2p = sqr - 2.0 * gram                 # (tm, tn)
    same = tcol_ref[...] == trow           # (tm, tn); padded columns never match

    ap_cand = jnp.where(same, d2p, -_BIG)
    an_cand = jnp.where(same, _BIG, d2p)   # padded columns land here at ~+1e30: never the min

    # Online batch-hard reduction (monotone sqrt -> selecting on squared dists is exact).
    dap_ref[...] = jnp.maximum(dap_ref[...], jnp.max(ap_cand, axis=1, keepdims=True))
    dan_ref[...] = jnp.minimum(dan_ref[...], jnp.min(an_cand, axis=1, keepdims=True))

    @pl.when(j == pl.num_programs(1) - 1)
    def _finalize():
        sqc = sqc_ref[...]                 # (tm, 1) query norms, f32
        # clamp(1e-12) + sqrt commute with max/min -> matches dist.clamp(1e-12).sqrt()
        dap_ref[...] = jnp.sqrt(jnp.maximum(dap_ref[...] + sqc, 1e-12))
        dan_ref[...] = jnp.sqrt(jnp.maximum(dan_ref[...] + sqc, 1e-12))


def triplet_loss(inputs, targets, margin=0.0, *, gram_dtype=None, max_key_tile=1024):
    """inputs: (n, d) float features, targets: (n,) int labels. Returns (loss, prec).

    gram_dtype: optional dtype for the Gram operands only (e.g. jnp.bfloat16 on v5e,
    where the MXU's f32 rate is the bottleneck); norms / reductions stay f32.
    """
    n, d = inputs.shape

    # Row tile: prefer 256, but keep >= 4 row tiles so v7x's two TCs stay balanced.
    tm = 256 if n >= 4 * 256 else 128
    n_pad = _round_up(n, tm)
    d_pad = _round_up(d, 128)

    # Key tile: as wide as possible (fewer grid steps / less per-step overhead).
    max_key_tile = max(128, (max_key_tile // 128) * 128)
    if n_pad <= max_key_tile:
        tn = n_pad
    else:
        tn = next(c for c in range(max_key_tile, 127, -128) if n_pad % c == 0)

    # Squared norms in f32 from the original-precision features (controls the
    # cancellation in ||xi||^2 + ||xj||^2 - 2<xi,xj>).
    xf = inputs.astype(jnp.float32)
    sq = jnp.sum(xf * xf, axis=1)                                   # (n,)

    xg = inputs if gram_dtype is None else inputs.astype(gram_dtype)
    x_q = jnp.zeros((n_pad, d_pad), xg.dtype).at[:n, :d].set(xg)
    x_kT = jnp.zeros((d_pad, n_pad), xg.dtype).at[:d, :n].set(xg.T)  # pre-transposed keys

    sq_col = jnp.zeros((n_pad, 1), jnp.float32).at[:n, 0].set(sq)
    # Padded key columns: huge norm sentinel -> never the hardest positive/negative.
    sq_row = jnp.full((1, n_pad), _BIG, jnp.float32).at[0, :n].set(sq)

    t = targets.astype(jnp.int32)
    pad_label = jnp.iinfo(jnp.int32).min     # sentinel no real label is expected to take
    t_col = jnp.full((n_pad, 1), pad_label, jnp.int32).at[:n, 0].set(t)
    t_row = jnp.full((1, n_pad), pad_label, jnp.int32).at[0, :n].set(t)

    grid = (n_pad // tm, n_pad // tn)

    dap, dan = pl.pallas_call(
        _triplet_kernel,
        out_shape=(jax.ShapeDtypeStruct((n_pad, 1), jnp.float32),
                   jax.ShapeDtypeStruct((n_pad, 1), jnp.float32)),
        grid_spec=pltpu.PrefetchScalarGridSpec(
            num_scalar_prefetch=0,
            grid=grid,
            in_specs=[
                pl.BlockSpec((tm, d_pad), lambda i, j: (i, 0)),   # query rows
                pl.BlockSpec((d_pad, tn), lambda i, j: (0, j)),   # keys (pre-transposed)
                pl.BlockSpec((tm, 1), lambda i, j: (i, 0)),       # ||x_q||^2
                pl.BlockSpec((1, n_pad), lambda i, j: (0, 0)),    # ||x_k||^2 (resident)
                pl.BlockSpec((tm, 1), lambda i, j: (i, 0)),       # labels (column)
                pl.BlockSpec((1, n_pad), lambda i, j: (0, 0)),    # labels (row, resident)
            ],
            out_specs=(
                pl.BlockSpec((tm, 1), lambda i, j: (i, 0)),       # dist_ap per row
                pl.BlockSpec((tm, 1), lambda i, j: (i, 0)),       # dist_an per row
            ),
        ),
        compiler_params=pltpu.CompilerParams(
            # Row axis shards across TensorCores; key axis is the sequential reduction.
            dimension_semantics=("parallel", "arbitrary"),
        ),
    )(x_q, x_kT, sq_col, sq_row, t_col, t_row)

    dap = dap[:n, 0]
    dan = dan[:n, 0]
    # MarginRankingLoss(dist_an, dist_ap, y=1) = mean(relu(dist_ap - dist_an + margin))
    loss = jnp.mean(jnp.maximum(dap - dan + jnp.float32(margin), 0.0))
    prec = jnp.mean((dan > dap).astype(jnp.float32))
    return loss, prec


def _reference(inputs, targets, margin):
    """Float64 numpy reference of the PyTorch forward pass."""
    x = np.asarray(inputs, dtype=np.float64)
    t = np.asarray(targets)
    sq = np.sum(x * x, axis=1, keepdims=True)
    dist = np.sqrt(np.maximum(sq + sq.T - 2.0 * (x @ x.T), 1e-12))
    mask = t[:, None] == t[None, :]
    dap = np.max(np.where(mask, dist, -np.inf), axis=1)
    dan = np.min(np.where(mask, np.inf, dist), axis=1)
    loss = np.mean(np.maximum(dap - dan + margin, 0.0))
    prec = np.mean((dan > dap).astype(np.float64))
    return loss, prec


if __name__ == "__main__":
    key = jax.random.PRNGKey(0)
    k1, k2, k3 = jax.random.split(key, 3)
    margin = 0.3  # TripletLoss(margin=0.3); module default is 0

    # --- small case: typical tiny-batch usage of the module ---
    n, d = 8, 32
    inputs = jax.random.normal(k1, (n, d), dtype=jnp.float32)
    targets = jnp.array([0, 0, 1, 1, 2, 2, 3, 3], dtype=jnp.int32)

    loss, prec = triplet_loss(inputs, targets, margin=margin)
    jax.block_until_ready((loss, prec))
    ref_loss, ref_prec = _reference(inputs, targets, margin)
    np.testing.assert_allclose(float(loss), ref_loss, rtol=5e-3, atol=5e-4)
    np.testing.assert_allclose(float(prec), ref_prec, rtol=0, atol=1.0 / n + 1e-6)

    # --- larger case: forces multi-key-tile accumulation (max_key_tile=128) and
    #     row / key / feature padding ---
    n2, d2 = 200, 96
    inputs2 = jax.random.normal(k2, (n2, d2), dtype=jnp.float32)
    targets2 = jax.random.randint(k3, (n2,), 0, 10, dtype=jnp.int32)

    loss2, prec2 = triplet_loss(inputs2, targets2, margin=margin, max_key_tile=128)
    jax.block_until_ready((loss2, prec2))
    ref_loss2, ref_prec2 = _reference(inputs2, targets2, margin)
    np.testing.assert_allclose(float(loss2), ref_loss2, rtol=5e-3, atol=5e-4)
    # prec is a count / n; allow one borderline flip between f64 ref and f32 kernel.
    np.testing.assert_allclose(float(prec2), ref_prec2, rtol=0, atol=1.0 / n2 + 1e-6)

    # --- bf16-Gram path (the v5e knob); norms/reductions stay f32, so only the
    #     Gram is perturbed -> loose tolerance on the loss only ---
    loss3, prec3 = triplet_loss(inputs2, targets2, margin=margin,
                                gram_dtype=jnp.bfloat16)
    jax.block_until_ready((loss3, prec3))
    assert np.isfinite(float(loss3)) and np.isfinite(float(prec3))
    np.testing.assert_allclose(float(loss3), ref_loss2, rtol=2e-2, atol=5e-2)

    print("KERNEL_OK")
</pallas_src>

<mosaic_0001>
module attributes {stable_mosaic.version = 11 : i64} {
  func.func @_triplet_kernel(%arg0: i32, %arg1: i32, %arg2: memref<128x128xf32, #tpu.memory_space<vmem>>, %arg3: memref<128x128xf32, #tpu.memory_space<vmem>>, %arg4: memref<128x1xf32, #tpu.memory_space<vmem>>, %arg5: memref<1x128xf32, #tpu.memory_space<vmem>>, %arg6: memref<128x1xi32, #tpu.memory_space<vmem>>, %arg7: memref<1x128xi32, #tpu.memory_space<vmem>>, %arg8: memref<128x1xf32, #tpu.memory_space<vmem>>, %arg9: memref<128x1xf32, #tpu.memory_space<vmem>>) attributes {dimension_semantics = [#tpu.dimension_semantics<parallel>, #tpu.dimension_semantics<arbitrary>], iteration_bounds = array<i64: 1, 1>, scalar_prefetch = 0 : i64, scratch_operands = 0 : i64, tpu.core_type = #tpu.core_type<tc>, window_params = [{transform_indices = @transform_0, window_bounds = array<i64: 128, 128>}, {transform_indices = @transform_1, window_bounds = array<i64: 128, 128>}, {transform_indices = @transform_2, window_bounds = array<i64: 128, 1>}, {pipeline_mode = #tpu.pipeline_mode<synchronous>, transform_indices = @transform_3, window_bounds = array<i64: 1, 128>}, {transform_indices = @transform_4, window_bounds = array<i64: 128, 1>}, {pipeline_mode = #tpu.pipeline_mode<synchronous>, transform_indices = @transform_5, window_bounds = array<i64: 1, 128>}, {transform_indices = @transform_6, window_bounds = array<i64: 128, 1>}, {transform_indices = @transform_7, window_bounds = array<i64: 128, 1>}]} {
    %c0_i32 = arith.constant 0 : i32
    %0 = arith.cmpi eq, %arg1, %c0_i32 : i32
    %1 = arith.extui %0 : i1 to i32
    %c0_i32_0 = arith.constant 0 : i32
    %2 = arith.cmpi ne, %1, %c0_i32_0 : i32
    scf.if %2 {
      %cst_23 = arith.constant -1.000000e+30 : f32
      %37 = vector.broadcast %cst_23 : f32 to vector<128x1xf32>
      %c0_24 = arith.constant 0 : index
      %c0_25 = arith.constant 0 : index
      %38 = vector.load %arg8[%c0_24, %c0_25] : memref<128x1xf32, #tpu.memory_space<vmem>>, vector<128x1xf32>
      tpu.vector_store %arg8[%c0_24, %c0_25], %37 {strides = array<i32>} : memref<128x1xf32, #tpu.memory_space<vmem>>, vector<128x1xf32>,
      %cst_26 = arith.constant 1.000000e+30 : f32
      %39 = vector.broadcast %cst_26 : f32 to vector<128x1xf32>
      %c0_27 = arith.constant 0 : index
      %c0_28 = arith.constant 0 : index
      %40 = vector.load %arg9[%c0_27, %c0_28] : memref<128x1xf32, #tpu.memory_space<vmem>>, vector<128x1xf32>
      tpu.vector_store %arg9[%c0_27, %c0_28], %39 {strides = array<i32>} : memref<128x1xf32, #tpu.memory_space<vmem>>, vector<128x1xf32>,
    } else {
    }
    %c0 = arith.constant 0 : index
    %c0_1 = arith.constant 0 : index
    %3 = vector.load %arg2[%c0, %c0_1] : memref<128x128xf32, #tpu.memory_space<vmem>>, vector<128x128xf32>
    %c0_2 = arith.constant 0 : index
    %c0_3 = arith.constant 0 : index
    %4 = vector.load %arg3[%c0_2, %c0_3] : memref<128x128xf32, #tpu.memory_space<vmem>>, vector<128x128xf32>
    %cst = arith.constant dense<0.000000e+00> : vector<128x128xf32>
    %5 = tpu.matmul %3, %4, %cst {dimension_numbers = #tpu.dot_dimension_numbers<[1], [0], [0], [1], [0, 0, 1, 1], [], []>} : vector<128x128xf32>, vector<128x128xf32>, vector<128x128xf32> -> vector<128x128xf32>
    %c128_i32 = arith.constant 128 : i32
    %6 = arith.muli %arg1, %c128_i32 : i32
    %7 = tpu.assume_multiple %6, 128 : i32
    %c0_4 = arith.constant 0 : index
    %8 = arith.index_cast %7 : i32 to index
    %9 = vector.load %arg5[%c0_4, %8] : memref<1x128xf32, #tpu.memory_space<vmem>>, vector<1x128xf32>
    %c0_5 = arith.constant 0 : index
    %10 = arith.index_cast %7 : i32 to index
    %11 = vector.load %arg7[%c0_5, %10] : memref<1x128xi32, #tpu.memory_space<vmem>>, vector<1x128xi32>
    %cst_6 = arith.constant 2.000000e+00 : f32
    %12 = vector.broadcast %cst_6 : f32 to vector<128x128xf32>
    %13 = arith.mulf %12, %5 : vector<128x128xf32>
    %14 = vector.broadcast %9 : vector<1x128xf32> to vector<128x128xf32>
    %15 = arith.subf %14, %13 : vector<128x128xf32>
    %c0_7 = arith.constant 0 : index
    %c0_8 = arith.constant 0 : index
    %16 = vector.load %arg6[%c0_7, %c0_8] : memref<128x1xi32, #tpu.memory_space<vmem>>, vector<128x1xi32>
    %17 = vector.broadcast %16 : vector<128x1xi32> to vector<128x128xi32>
    %18 = vector.broadcast %11 : vector<1x128xi32> to vector<128x128xi32>
    %19 = arith.cmpi eq, %17, %18 : vector<128x128xi32>
    %cst_9 = arith.constant -1.000000e+30 : f32
    %20 = vector.broadcast %cst_9 : f32 to vector<128x128xf32>
    %21 = arith.select %19, %15, %20 : vector<128x128xi1>, vector<128x128xf32>
    %cst_10 = arith.constant 1.000000e+30 : f32
    %22 = vector.broadcast %cst_10 : f32 to vector<128x128xf32>
    %23 = arith.select %19, %22, %15 : vector<128x128xi1>, vector<128x128xf32>
    %c0_11 = arith.constant 0 : index
    %c0_12 = arith.constant 0 : index
    %24 = vector.load %arg8[%c0_11, %c0_12] : memref<128x1xf32, #tpu.memory_space<vmem>>, vector<128x1xf32>
    %cst_13 = arith.constant dense<0xFF800000> : vector<128xf32>
    %25 = vector.multi_reduction <maximumf>, %21, %cst_13 [1] : vector<128x128xf32> to vector<128xf32>
    %26 = vector.shape_cast %25 : vector<128xf32> to vector<128x1xf32>
    %27 = arith.maximumf %24, %26 : vector<128x1xf32>
    %c0_14 = arith.constant 0 : index
    %c0_15 = arith.constant 0 : index
    %28 = vector.load %arg8[%c0_14, %c0_15] : memref<128x1xf32, #tpu.memory_space<vmem>>, vector<128x1xf32>
    tpu.vector_store %arg8[%c0_14, %c0_15], %27 {strides = array<i32>} : memref<128x1xf32, #tpu.memory_space<vmem>>, vector<128x1xf32>,
    %c0_16 = arith.constant 0 : index
    %c0_17 = arith.constant 0 : index
    %29 = vector.load %arg9[%c0_16, %c0_17] : memref<128x1xf32, #tpu.memory_space<vmem>>, vector<128x1xf32>
    %cst_18 = arith.constant dense<0x7F800000> : vector<128xf32>
    %30 = vector.multi_reduction <minimumf>, %23, %cst_18 [1] : vector<128x128xf32> to vector<128xf32>
    %31 = vector.shape_cast %30 : vector<128xf32> to vector<128x1xf32>
    %32 = arith.minimumf %29, %31 : vector<128x1xf32>
    %c0_19 = arith.constant 0 : index
    %c0_20 = arith.constant 0 : index
    %33 = vector.load %arg9[%c0_19, %c0_20] : memref<128x1xf32, #tpu.memory_space<vmem>>, vector<128x1xf32>
    tpu.vector_store %arg9[%c0_19, %c0_20], %32 {strides = array<i32>} : memref<128x1xf32, #tpu.memory_space<vmem>>, vector<128x1xf32>,
    %c0_i32_21 = arith.constant 0 : i32
    %34 = arith.cmpi eq, %arg1, %c0_i32_21 : i32
    %35 = arith.extui %34 : i1 to i32
    %c0_i32_22 = arith.constant 0 : i32
    %36 = arith.cmpi ne, %35, %c0_i32_22 : i32
    scf.if %36 {
      %c0_23 = arith.constant 0 : index
      %c0_24 = arith.constant 0 : index
      %37 = vector.load %arg4[%c0_23, %c0_24] : memref<128x1xf32, #tpu.memory_space<vmem>>, vector<128x1xf32>
      %c0_25 = arith.constant 0 : index
      %c0_26 = arith.constant 0 : index
      %38 = vector.load %arg8[%c0_25, %c0_26] : memref<128x1xf32, #tpu.memory_space<vmem>>, vector<128x1xf32>
      %39 = arith.addf %38, %37 : vector<128x1xf32>
      %cst_27 = arith.constant 9.99999996E-13 : f32
      %40 = vector.broadcast %cst_27 : f32 to vector<128x1xf32>
      %41 = arith.maximumf %39, %40 : vector<128x1xf32>
      %42 = math.sqrt %41 : vector<128x1xf32>
      %c0_28 = arith.constant 0 : index
      %c0_29 = arith.constant 0 : index
      %43 = vector.load %arg8[%c0_28, %c0_29] : memref<128x1xf32, #tpu.memory_space<vmem>>, vector<128x1xf32>
      tpu.vector_store %arg8[%c0_28, %c0_29], %42 {strides = array<i32>} : memref<128x1xf32, #tpu.memory_space<vmem>>, vector<128x1xf32>,
      %c0_30 = arith.constant 0 : index
      %c0_31 = arith.constant 0 : index
      %44 = vector.load %arg9[%c0_30, %c0_31] : memref<128x1xf32, #tpu.memory_space<vmem>>, vector<128x1xf32>
      %45 = arith.addf %44, %37 : vector<128x1xf32>
      %cst_32 = arith.constant 9.99999996E-13 : f32
      %46 = vector.broadcast %cst_32 : f32 to vector<128x1xf32>
      %47 = arith.maximumf %45, %46 : vector<128x1xf32>
      %48 = math.sqrt %47 : vector<128x1xf32>
      %c0_33 = arith.constant 0 : index
      %c0_34 = arith.constant 0 : index
      %49 = vector.load %arg9[%c0_33, %c0_34] : memref<128x1xf32, #tpu.memory_space<vmem>>, vector<128x1xf32>
      tpu.vector_store %arg9[%c0_33, %c0_34], %48 {strides = array<i32>} : memref<128x1xf32, #tpu.memory_space<vmem>>, vector<128x1xf32>,
    } else {
    }
    return
  }
  func.func @transform_0(%arg0: i32, %arg1: i32) -> (i32, i32) {
    %c0_i32 = arith.constant 0 : i32
    %c0_i32_0 = arith.constant 0 : i32
    return %arg0, %c0_i32 : i32, i32
  }
  func.func @transform_1(%arg0: i32, %arg1: i32) -> (i32, i32) {
    %c0_i32 = arith.constant 0 : i32
    %c0_i32_0 = arith.constant 0 : i32
    return %c0_i32, %arg1 : i32, i32
  }
  func.func @transform_2(%arg0: i32, %arg1: i32) -> (i32, i32) {
    %c0_i32 = arith.constant 0 : i32
    %c0_i32_0 = arith.constant 0 : i32
    return %arg0, %c0_i32 : i32, i32
  }
  func.func @transform_3(%arg0: i32, %arg1: i32) -> (i32, i32) {
    %c0_i32 = arith.constant 0 : i32
    %c0_i32_0 = arith.constant 0 : i32
    %c0_i32_1 = arith.constant 0 : i32
    return %c0_i32, %c0_i32_0 : i32, i32
  }
  func.func @transform_4(%arg0: i32, %arg1: i32) -> (i32, i32) {
    %c0_i32 = arith.constant 0 : i32
    %c0_i32_0 = arith.constant 0 : i32
    return %arg0, %c0_i32 : i32, i32
  }
  func.func @transform_5(%arg0: i32, %arg1: i32) -> (i32, i32) {
    %c0_i32 = arith.constant 0 : i32
    %c0_i32_0 = arith.constant 0 : i32
    %c0_i32_1 = arith.constant 0 : i32
    return %c0_i32, %c0_i32_0 : i32, i32
  }
  func.func @transform_6(%arg0: i32, %arg1: i32) -> (i32, i32) {
    %c0_i32 = arith.constant 0 : i32
    %c0_i32_0 = arith.constant 0 : i32
    return %arg0, %c0_i32 : i32, i32
  }
  func.func @transform_7(%arg0: i32, %arg1: i32) -> (i32, i32) {
    %c0_i32 = arith.constant 0 : i32
    %c0_i32_0 = arith.constant 0 : i32
    return %arg0, %c0_i32 : i32, i32
  }
}

</mosaic_0001>

<bundles_post_ra>
// kernel: tpu_custom_call.1
= control target key start
LH: loop header
LB: loop body
LE: loop exit
PB: predicated region body
PF: predicated region fallthrough
CT: control target
= control target key end

     0   :  { %v1133_v2 = vmov 0   ;;  %vm29_vm0 = vcmask 7168   ;;  %v1134_v49 = vmov -1e+30   ;;  %s2444_s1 = inlined_call_operand.vmem [shape: f32[128,128], index: 1, kind: input, shape index: {}]   ;;  %s2445_s0 = inlined_call_operand.vmem [shape: f32[128,128], index: 0, kind: input, shape index: {}]   ;;  %s2446_s4 = inlined_call_operand.vmem [shape: s32[128,1], index: 4, kind: input, shape index: {}]   ;;  %s2447_s6 = inlined_call_operand.vmem [shape: f32[128,1], index: 6, kind: output, shape index: {0}]   ;;  %s2448_s3 = inlined_call_operand.vmem [shape: f32[1,128], index: 3, kind: input, shape index: {}]   ;;  %s2449_s5 = inlined_call_operand.vmem [shape: s32[1,128], index: 5, kind: input, shape index: {}]   ;;  %s2450_s7 = inlined_call_operand.vmem [shape: f32[128,1], index: 7, kind: output, shape index: {1}]   ;;  %s2451_s2 = inlined_call_operand.vmem [shape: f32[128,1], index: 2, kind: input, shape index: {}]  }
   0x1   :  { %v93_v0 = vld [vmem:[%s2444_s1 + $0x78] sm:$0xff]  ;;  %v92_v1 = vld [vmem:[%s2444_s1 + $0x70] sm:$0xff]  ;;  %1068 = vset.pattern.permute.xlu1 %v1133_v2  ;;  %1067 = vset.pattern.permute.xlu0 %v1133_v2  ;;  %v91_v3 = vld [vmem:[%s2444_s1 + $0x68] sm:$0xff]  ;;  %39 = vst.msk [vmem:[%s2447_s6 + $0x48] sm:$0xff] %vm29_vm0, %v1134_v49 }
   0x2   :  { %976 = vmatprep.subr.mxu0 %v93_v0  ;;  %1032 = vmatprep.subr.mxu1 %v93_v0  ;;  %v90_v4 = vld [vmem:[%s2444_s1 + $0x60] sm:$0xff]  ;;  %v89_v5 = vld [vmem:[%s2444_s1 + $0x58] sm:$0xff]  ;;  %v88_v6 = vld [vmem:[%s2444_s1 + $0x50] sm:$0xff]  ;;  %30 = vst.msk [vmem:[%s2447_s6] sm:$0xff] %vm29_vm0, %v1134_v49 }
   0x3   :  { %977 = vmatpush3.msra.mxu0 %v93_v0  ;;  %1048 = vmatpush3.msra.mxu1 %v93_v0  ;;  %v87_v7 = vld [vmem:[%s2444_s1 + $0x48] sm:$0xff]  ;;  %v86_v8 = vld [vmem:[%s2444_s1 + $0x40] sm:$0xff]  ;;  %v85_v9 = vld [vmem:[%s2444_s1 + $0x38] sm:$0xff]  ;;  %31 = vst.msk [vmem:[%s2447_s6 + $0x8] sm:$0xff] %vm29_vm0, %v1134_v49 }
   0x4   :  { %978 = vmatprep.subr.mxu0 %v92_v1  ;;  %1033 = vmatprep.subr.mxu1 %v92_v1  ;;  %v84_v10 = vld [vmem:[%s2444_s1 + $0x30] sm:$0xff]  ;;  %v83_v11 = vld [vmem:[%s2444_s1 + $0x28] sm:$0xff]  ;;  %v82_v12 = vld [vmem:[%s2444_s1 + $0x20] sm:$0xff]  ;;  %32 = vst.msk [vmem:[%s2447_s6 + $0x10] sm:$0xff] %vm29_vm0, %v1134_v49 }
   0x5   :  { %979 = vmatpush3.msra.mxu0 %v92_v1  ;;  %1049 = vmatpush3.msra.mxu1 %v92_v1  ;;  %v81_v13 = vld [vmem:[%s2444_s1 + $0x18] sm:$0xff]  ;;  %v80_v14 = vld [vmem:[%s2444_s1 + $0x10] sm:$0xff]  ;;  %v79_v15 = vld [vmem:[%s2444_s1 + $0x8] sm:$0xff]  ;;  %33 = vst.msk [vmem:[%s2447_s6 + $0x18] sm:$0xff] %vm29_vm0, %v1134_v49 }
   0x6   :  { %980 = vmatprep.subr.mxu0 %v91_v3  ;;  %1034 = vmatprep.subr.mxu1 %v91_v3  ;;  %v78_v16 = vld [vmem:[%s2444_s1] sm:$0xff]  ;;  %v63_v19 = vld [vmem:[%s2445_s0 + $0x8] sm:$0xff]  ;;  %v64_v21 = vld [vmem:[%s2445_s0 + $0x10] sm:$0xff]  ;;  %34 = vst.msk [vmem:[%s2447_s6 + $0x20] sm:$0xff] %vm29_vm0, %v1134_v49 }
   0x7   :  { %981 = vmatpush3.msra.mxu0 %v91_v3  ;;  %1050 = vmatpush3.msra.mxu1 %v91_v3  ;;  %v62_v17 = vld [vmem:[%s2445_s0] sm:$0xff]  ;;  %v71_v20 = vld [vmem:[%s2445_s0 + $0x48] sm:$0xff]  ;;  %v72_v22 = vld [vmem:[%s2445_s0 + $0x50] sm:$0xff]  ;;  %35 = vst.msk [vmem:[%s2447_s6 + $0x28] sm:$0xff] %vm29_vm0, %v1134_v49 }
   0x8   :  { %982 = vmatprep.subr.mxu0 %v90_v4  ;;  %1035 = vmatprep.subr.mxu1 %v90_v4  ;;  %v70_v18 = vld [vmem:[%s2445_s0 + $0x40] sm:$0xff]  ;;  %v286_v23 = vld [vmem:[%s2446_s4 + $0x10] sm:$0xff]  ;;  %v65_v25 = vld [vmem:[%s2445_s0 + $0x18] sm:$0xff]  ;;  %36 = vst.msk [vmem:[%s2447_s6 + $0x30] sm:$0xff] %vm29_vm0, %v1134_v49 }
   0x9   :  { %983 = vmatpush3.msra.mxu0 %v90_v4  ;;  %1051 = vmatpush3.msra.mxu1 %v90_v4  ;;  %v284_v24 = vld [vmem:[%s2446_s4] sm:$0xff]  ;;  %v73_v26 = vld [vmem:[%s2445_s0 + $0x58] sm:$0xff]  ;;  %v285_v30 = vld [vmem:[%s2446_s4 + $0x8] sm:$0xff]  ;;  %37 = vst.msk [vmem:[%s2447_s6 + $0x38] sm:$0xff] %vm29_vm0, %v1134_v49 }
   0xa   :  { %984 = vmatprep.subr.mxu0 %v89_v5  ;;  %1036 = vmatprep.subr.mxu1 %v89_v5  ;;  %v66_v27 = vld [vmem:[%s2445_s0 + $0x20] sm:$0xff]  ;;  %v287_v29 = vld [vmem:[%s2446_s4 + $0x18] sm:$0xff]  ;;  %v67_v31 = vld [vmem:[%s2445_s0 + $0x28] sm:$0xff]  ;;  %38 = vst.msk [vmem:[%s2447_s6 + $0x40] sm:$0xff] %vm29_vm0, %v1134_v49 }
   0xb   :  { %985 = vmatpush3.msra.mxu0 %v89_v5  ;;  %1052 = vmatpush3.msra.mxu1 %v89_v5  ;;  %v74_v28 = vld [vmem:[%s2445_s0 + $0x60] sm:$0xff]  ;;  %v75_v32 = vld [vmem:[%s2445_s0 + $0x68] sm:$0xff]  ;;  %v68_v33 = vld [vmem:[%s2445_s0 + $0x30] sm:$0xff]  ;;  %40 = vst.msk [vmem:[%s2447_s6 + $0x50] sm:$0xff] %vm29_vm0, %v1134_v49 }
   0xc   :  { %986 = vmatprep.subr.mxu0 %v88_v6  ;;  %1037 = vmatprep.subr.mxu1 %v88_v6  ;;  %v76_v34 = vld [vmem:[%s2445_s0 + $0x70] sm:$0xff]  ;;  %v289_v35 = vld [vmem:[%s2446_s4 + $0x28] sm:$0xff]  ;;  %v288_v36 = vld [vmem:[%s2446_s4 + $0x20] sm:$0xff]  ;;  %41 = vst.msk [vmem:[%s2447_s6 + $0x58] sm:$0xff] %vm29_vm0, %v1134_v49 }
   0xd   :  { %987 = vmatpush3.msra.mxu0 %v88_v6  ;;  %1053 = vmatpush3.msra.mxu1 %v88_v6  ;;  %v69_v37 = vld [vmem:[%s2445_s0 + $0x38] sm:$0xff]  ;;  %v290_v40 = vld [vmem:[%s2446_s4 + $0x30] sm:$0xff]  ;;  %v293_v41 = vld [vmem:[%s2446_s4 + $0x48] sm:$0xff]  ;;  %42 = vst.msk [vmem:[%s2447_s6 + $0x60] sm:$0xff] %vm29_vm0, %v1134_v49 }
   0xe   :  { %988 = vmatprep.subr.mxu0 %v87_v7  ;;  %1038 = vmatprep.subr.mxu1 %v87_v7  ;;  %v77_v38 = vld [vmem:[%s2445_s0 + $0x78] sm:$0xff]  ;;  %v292_v42 = vld [vmem:[%s2446_s4 + $0x40] sm:$0xff]  ;;  %v294_v44 = vld [vmem:[%s2446_s4 + $0x50] sm:$0xff]  ;;  %43 = vst.msk [vmem:[%s2447_s6 + $0x68] sm:$0xff] %vm29_vm0, %v1134_v49 }
   0xf   :  { %989 = vmatpush3.msra.mxu0 %v87_v7  ;;  %1054 = vmatpush3.msra.mxu1 %v87_v7  ;;  %v291_v39 = vld [vmem:[%s2446_s4 + $0x38] sm:$0xff]  ;;  %v297_v45 = vld [vmem:[%s2446_s4 + $0x68] sm:$0xff]  ;;  %v296_v46 = vld [vmem:[%s2446_s4 + $0x60] sm:$0xff]  ;;  %44 = vst.msk [vmem:[%s2447_s6 + $0x70] sm:$0xff] %vm29_vm0, %v1134_v49 }
  0x10   :  { %990 = vmatprep.subr.mxu0 %v86_v8  ;;  %1039 = vmatprep.subr.mxu1 %v86_v8  ;;  %v295_v43 = vld [vmem:[%s2446_s4 + $0x58] sm:$0xff]  ;;  %v298_v48 = vld [vmem:[%s2446_s4 + $0x70] sm:$0xff]  ;;  %45 = vst.msk [vmem:[%s2447_s6 + $0x78] sm:$0xff] %vm29_vm0, %v1134_v49  ;;  %v1397_v59 = vld [vmem:[%s2448_s3] ss:$0 sm:$0xff] }
  0x11   :  { %991 = vmatpush3.msra.mxu0 %v86_v8  ;;  %1055 = vmatpush3.msra.mxu1 %v86_v8  ;;  %v299_v47 = vld [vmem:[%s2446_s4 + $0x78] sm:$0xff]  ;;  %v1402_v60 = vld [vmem:[%s2449_s5] ss:$0 sm:$0xff] }
  0x12   :  { %992 = vmatprep.subr.mxu0 %v85_v9  ;;  %1040 = vmatprep.subr.mxu1 %v85_v9 }
  0x13   :  { %993 = vmatpush3.msra.mxu0 %v85_v9  ;;  %1056 = vmatpush3.msra.mxu1 %v85_v9 }
  0x14   :  { %994 = vmatprep.subr.mxu0 %v84_v10  ;;  %1041 = vmatprep.subr.mxu1 %v84_v10 }
  0x15   :  { %995 = vmatpush3.msra.mxu0 %v84_v10  ;;  %1057 = vmatpush3.msra.mxu1 %v84_v10 }
  0x16   :  { %996 = vmatprep.subr.mxu0 %v83_v11  ;;  %1042 = vmatprep.subr.mxu1 %v83_v11 }
  0x17   :  { %997 = vmatpush3.msra.mxu0 %v83_v11  ;;  %1058 = vmatpush3.msra.mxu1 %v83_v11 }
  0x18   :  { %998 = vmatprep.subr.mxu0 %v82_v12  ;;  %1043 = vmatprep.subr.mxu1 %v82_v12 }
  0x19   :  { %999 = vmatpush3.msra.mxu0 %v82_v12  ;;  %1059 = vmatpush3.msra.mxu1 %v82_v12 }
  0x1a   :  { %1000 = vmatprep.subr.mxu0 %v81_v13  ;;  %1044 = vmatprep.subr.mxu1 %v81_v13 }
  0x1b   :  { %1001 = vmatpush3.msra.mxu0 %v81_v13  ;;  %1060 = vmatpush3.msra.mxu1 %v81_v13 }
  0x1c   :  { %1002 = vmatprep.subr.mxu0 %v80_v14  ;;  %1045 = vmatprep.subr.mxu1 %v80_v14 }
  0x1d   :  { %1003 = vmatpush3.msra.mxu0 %v80_v14  ;;  %1061 = vmatpush3.msra.mxu1 %v80_v14 }
  0x1e   :  { %1004 = vmatprep.subr.mxu0 %v79_v15  ;;  %1046 = vmatprep.subr.mxu1 %v79_v15 }
  0x1f   :  { %1005 = vmatpush3.msra.mxu0 %v79_v15  ;;  %1062 = vmatpush3.msra.mxu1 %v79_v15 }
  0x20   :  { %1006 = vmatprep.subr.mxu0 %v78_v16  ;;  %1047 = vmatprep.subr.mxu1 %v78_v16 }
  0x21   :  { %1007 = vmatpush3.msra.mxu0 %v78_v16  ;;  %1063 = vmatpush3.msra.mxu1 %v78_v16 }
  0x22   :  { %1008 = vmatprep.mubr.f32.mxu0 %v62_v17  ;;  %1020 = vmatprep.mubr.f32.mxu1 %v70_v18 }
  0x23   :  { %1009 = vmatmul.mubr.f32.vlgmr.msra.gmra.mxu0 %v63_v19  ;;  %1021 = vmatmul.mubr.f32.vlgmr.msra.gmra.mxu1 %v71_v20 }
  0x24   :  { %1011 = vmatprep.mubr.f32.mxu0 %v64_v21  ;;  %1023 = vmatprep.mubr.f32.mxu1 %v72_v22 }
  0x25   :  { %307 = vperm.xlu1 %1068, %v286_v23   ;;  %301 = vperm.xlu0 %1067, %v284_v24  }
  0x27   :  { %1012 = vmatmul.mubr.f32.gmra.mxu0 %v65_v25  ;;  %1024 = vmatmul.mubr.f32.gmra.mxu1 %v73_v26 }
  0x28   :  { %1014 = vmatprep.mubr.f32.mxu0 %v66_v27  ;;  %1026 = vmatprep.mubr.f32.mxu1 %v74_v28 }
  0x29   :  { %310 = vperm.xlu1 %1068, %v287_v29   ;;  %304 = vperm.xlu0 %1067, %v285_v30   ;;  %v1135_v30 = vmov 1e+30  }
  0x2a   :  { %47 = vst.msk [vmem:[%s2450_s7 + $0x8] sm:$0xff] %vm29_vm0, %v1135_v30  ;;  %46 = vst.msk [vmem:[%s2450_s7] sm:$0xff] %vm29_vm0, %v1135_v30 }
  0x2b   :  { %1015 = vmatmul.mubr.f32.gmra.mxu0 %v67_v31  ;;  %1027 = vmatmul.mubr.f32.gmra.mxu1 %v75_v32  ;;  %48 = vst.msk [vmem:[%s2450_s7 + $0x10] sm:$0xff] %vm29_vm0, %v1135_v30  ;;  %49 = vst.msk [vmem:[%s2450_s7 + $0x18] sm:$0xff] %vm29_vm0, %v1135_v30 }
  0x2c   :  { %1017 = vmatprep.mubr.f32.mxu0 %v68_v33  ;;  %1029 = vmatprep.mubr.f32.mxu1 %v76_v34  ;;  %50 = vst.msk [vmem:[%s2450_s7 + $0x20] sm:$0xff] %vm29_vm0, %v1135_v30  ;;  %51 = vst.msk [vmem:[%s2450_s7 + $0x28] sm:$0xff] %vm29_vm0, %v1135_v30 }
  0x2d   :  { %316 = vperm.xlu1 %1068, %v289_v35   ;;  %313 = vperm.xlu0 %1067, %v288_v36   ;;  %52 = vst.msk [vmem:[%s2450_s7 + $0x30] sm:$0xff] %vm29_vm0, %v1135_v30  ;;  %53 = vst.msk [vmem:[%s2450_s7 + $0x38] sm:$0xff] %vm29_vm0, %v1135_v30 }
  0x2e   :  { %54 = vst.msk [vmem:[%s2450_s7 + $0x40] sm:$0xff] %vm29_vm0, %v1135_v30  ;;  %55 = vst.msk [vmem:[%s2450_s7 + $0x48] sm:$0xff] %vm29_vm0, %v1135_v30 }
  0x2f   :  { %1018 = vmatmul.mubr.f32.gmra.mxu0 %v69_v37  ;;  %1030 = vmatmul.mubr.f32.gmra.mxu1 %v77_v38  ;;  %56 = vst.msk [vmem:[%s2450_s7 + $0x50] sm:$0xff] %vm29_vm0, %v1135_v30  ;;  %57 = vst.msk [vmem:[%s2450_s7 + $0x58] sm:$0xff] %vm29_vm0, %v1135_v30 }
  0x30   :  { %58 = vst.msk [vmem:[%s2450_s7 + $0x60] sm:$0xff] %vm29_vm0, %v1135_v30  ;;  %59 = vst.msk [vmem:[%s2450_s7 + $0x68] sm:$0xff] %vm29_vm0, %v1135_v30 }
  0x31   :  { %322 = vperm.xlu1 %1068, %v291_v39   ;;  %319 = vperm.xlu0 %1067, %v290_v40   ;;  %60 = vst.msk [vmem:[%s2450_s7 + $0x70] sm:$0xff] %vm29_vm0, %v1135_v30  ;;  %61 = vst.msk [vmem:[%s2450_s7 + $0x78] sm:$0xff] %vm29_vm0, %v1135_v30 }
  0x35   :  { %328 = vperm.xlu1 %1068, %v293_v41   ;;  %325 = vperm.xlu0 %1067, %v292_v42  }
  0x39   :  { %334 = vperm.xlu1 %1068, %v295_v43   ;;  %331 = vperm.xlu0 %1067, %v294_v44  }
  0x3d   :  { %340 = vperm.xlu1 %1068, %v297_v45   ;;  %337 = vperm.xlu0 %1067, %v296_v46  }
  0x41   :  { %346 = vperm.xlu1 %1068, %v299_v47   ;;  %343 = vperm.xlu0 %1067, %v298_v48  }
  0xa0   :  { %v1384_v50 = vpop.permute.xlu1 %307  ;;  %v302_v51 = vpop.permute.xlu0 %301 }
  0xa1   :  { %vm352_vm4 = vcmp.eq.s32.totalorder %v302_v51, %v1402_v60  ;;  %vm354_vm7 = vcmp.eq.s32.totalorder %v1384_v50, %v1402_v60 }
  0xa4   :  { %v1386_v52 = vpop.permute.xlu1 %310  ;;  %v305_v53 = vpop.permute.xlu0 %304 }
  0xa5   :  { %vm353_vm2 = vcmp.eq.s32.totalorder %v305_v53, %v1402_v60  ;;  %vm355_vm5 = vcmp.eq.s32.totalorder %v1386_v52, %v1402_v60 }
  0xa8   :  { %v1388_v54 = vpop.permute.xlu1 %316  ;;  %v1390_v55 = vpop.permute.xlu0 %313 }
  0xa9   :  { %vm356_vm9 = vcmp.eq.s32.totalorder %v1390_v55, %v1402_v60  ;;  %vm357_vm11 = vcmp.eq.s32.totalorder %v1388_v54, %v1402_v60 }
  0xac   :  { %v1392_v56 = vpop.permute.xlu1 %322  ;;  %v1404_v61 = vpop.permute.xlu0 %319 }
  0xad   :  { %vm358_vm13 = vcmp.eq.s32.totalorder %v1404_v61, %v1402_v60  ;;  %vm359_vm15 = vcmp.eq.s32.totalorder %v1392_v56, %v1402_v60  ;;  %v409_v61 = vld [vmem:[%s2447_s6 + $0x48] sm:$0xff] }
  0xb0   :  { %v329_v2 = vpop.permute.xlu1 %328  ;;  %v326_v11 = vpop.permute.xlu0 %325 }
  0xb1   :  { %vm361_vm1 = vcmp.eq.s32.totalorder %v329_v2, %v1402_v60  ;;  %vm360_vm3 = vcmp.eq.s32.totalorder %v326_v11, %v1402_v60 }
  0xb4   :  { %v332_v29 = vpop.permute.xlu0 %331  ;;  %v335_v37 = vpop.permute.xlu1 %334 }
  0xb5   :  { %vm362_vm6 = vcmp.eq.s32.totalorder %v332_v29, %v1402_v60  ;;  %vm363_vm8 = vcmp.eq.s32.totalorder %v335_v37, %v1402_v60 }
  0xb8   :  { %v338_v52 = vpop.permute.xlu0 %337 }
  0xb9   :  { %vm364_vm10 = vcmp.eq.s32.totalorder %v338_v52, %v1402_v60  ;;  %v572_v52 = vld [vmem:[%s2451_s2 + $0x40] sm:$0xff] }
  0xbc   :  { %v344_v55 = vpop.permute.xlu0 %343 }
  0xbd   :  { %vm366_vm14 = vcmp.eq.s32.totalorder %v344_v55, %v1402_v60 }
  0xe3   :  { %v1010_v57 = vpop.f32.mrf.mxu0  ;;  %v1022_v58 = vpop.f32.mrf.mxu1 }
  0xe4   :  { %v247_v62 = vmul.f32 2.0, %v1010_v57  ;;  %v255_v63 = vmul.f32 2.0, %v1022_v58 }
  0xe5   :  { %v160_v0 = vpop.f32.mrf.mxu0  ;;  %v200_v1 = vpop.f32.mrf.mxu1 }
  0xe6   :  { %v254_v3 = vmul.f32 2.0, %v200_v1  ;;  %v277_v4 = vsub.f32 %v1397_v59, %v255_v63  ;;  %v269_v5 = vsub.f32 %v1397_v59, %v247_v62  ;;  %v246_v6 = vmul.f32 2.0, %v160_v0 }
  0xe7   :  { %v1025_v9 = vpop.f32.mrf.mxu1  ;;  %v1013_v12 = vpop.f32.mrf.mxu0 }
  0xe8   :  { %v377_v7 = vsel %vm361_vm1, %v277_v4, -1e+30  ;;  %v369_v8 = vsel %vm353_vm2, %v269_v5, -1e+30  ;;  %v276_v10 = vsub.f32 %v1397_v59, %v254_v3  ;;  %v385_v13 = vsel %vm353_vm2, 1e+30, %v269_v5  ;;  %v341_v5 = vpop.permute.xlu1 %340 }
  0xe9   :  { %434 = vmax.xlane.f32.xlu0 %v377_v7  ;;  %418 = vmax.xlane.f32.xlu1 %v369_v8  ;;  %v268_v15 = vsub.f32 %v1397_v59, %v246_v6  ;;  %v210_v16 = vpop.f32.mrf.mxu1  ;;  %v249_v17 = vmul.f32 2.0, %v1013_v12  ;;  %v170_v19 = vpop.f32.mrf.mxu0  ;;  %v393_v20 = vsel %vm361_vm1, 1e+30, %v277_v4  ;;  %v257_v22 = vmul.f32 2.0, %v1025_v9 }
  0xea   :  { %v376_v14 = vsel %vm360_vm3, %v276_v10, -1e+30  ;;  %v256_v18 = vmul.f32 2.0, %v210_v16  ;;  %v248_v23 = vmul.f32 2.0, %v170_v19  ;;  %v392_v24 = vsel %vm360_vm3, 1e+30, %v276_v10 }
  0xeb   :  { %v384_v21 = vsel %vm352_vm4, 1e+30, %v268_v15  ;;  %v368_v25 = vsel %vm352_vm4, %v268_v15, -1e+30  ;;  %v271_v27 = vsub.f32 %v1397_v59, %v249_v17  ;;  %v1016_v28 = vpop.f32.mrf.mxu0  ;;  %v279_v33 = vsub.f32 %v1397_v59, %v257_v22  ;;  %v1028_v35 = vpop.f32.mrf.mxu1 }
  0xec   :  { %v278_v26 = vsub.f32 %v1397_v59, %v256_v18  ;;  %v270_v34 = vsub.f32 %v1397_v59, %v248_v23  ;;  %v251_v46 = vmul.f32 2.0, %v1016_v28  ;;  %v259_v53 = vmul.f32 2.0, %v1028_v35  ;;  %v347_v54 = vpop.permute.xlu1 %346  ;;  %v408_v28 = vld [vmem:[%s2447_s6 + $0x40] sm:$0xff]  ;;  %v573_v35 = vld [vmem:[%s2451_s2 + $0x48] sm:$0xff] }
  0xed   :  { %499 = vmin.xlane.f32.xlu0 %v385_v13  ;;  %432 = vmax.xlane.f32.xlu1 %v376_v14  ;;  %v371_v32 = vsel %vm355_vm5, %v271_v27, -1e+30  ;;  %v180_v36 = vpop.f32.mrf.mxu0  ;;  %v379_v39 = vsel %vm363_vm8, %v279_v33, -1e+30  ;;  %v220_v41 = vpop.f32.mrf.mxu1  ;;  %v387_v43 = vsel %vm355_vm5, 1e+30, %v271_v27  ;;  %vm365_vm12 = vcmp.eq.s32.totalorder %v341_v5, %v1402_v60 }
  0xee   :  { %v378_v31 = vsel %vm362_vm6, %v278_v26, -1e+30  ;;  %v250_v38 = vmul.f32 2.0, %v180_v36  ;;  %v386_v40 = vsel %vm354_vm7, 1e+30, %v270_v34  ;;  %v258_v42 = vmul.f32 2.0, %v220_v41 }
  0xef   :  { %v394_v44 = vsel %vm362_vm6, 1e+30, %v278_v26  ;;  %v395_v47 = vsel %vm363_vm8, 1e+30, %v279_v33  ;;  %v1019_v51 = vpop.f32.mrf.mxu0  ;;  %v370_v57 = vsel %vm354_vm7, %v270_v34, -1e+30  ;;  %v273_v62 = vsub.f32 %v1397_v59, %v251_v46  ;;  %v1031_v63 = vpop.f32.mrf.mxu1 }
  0xf0   :  { %v272_v45 = vsub.f32 %v1397_v59, %v250_v38  ;;  %v280_v49 = vsub.f32 %v1397_v59, %v258_v42  ;;  %v281_v3 = vsub.f32 %v1397_v59, %v259_v53  ;;  %v253_v10 = vmul.f32 2.0, %v1019_v51  ;;  %v490_v33 = vld [vmem:[%s2450_s7 + $0x48] sm:$0xff]  ;;  %v481_v34 = vld [vmem:[%s2450_s7] sm:$0xff] }
  0xf1   :  { %515 = vmin.xlane.f32.xlu0 %v393_v20  ;;  %497 = vmin.xlane.f32.xlu1 %v384_v21  ;;  %v190_v0 = vpop.f32.mrf.mxu0  ;;  %v373_v2 = vsel %vm357_vm11, %v273_v62, -1e+30  ;;  %v230_v4 = vpop.f32.mrf.mxu1  ;;  %v389_v12 = vsel %vm357_vm11, 1e+30, %v273_v62  ;;  %v261_v14 = vmul.f32 2.0, %v1031_v63  ;;  %vm367_vm1 = vcmp.eq.s32.totalorder %v347_v54, %v1402_v60  ;;  %v482_v60 = vld [vmem:[%s2450_s7 + $0x8] sm:$0xff] }
  0xf2   :  { %v372_v48 = vsel %vm356_vm9, %v272_v45, -1e+30  ;;  %v380_v58 = vsel %vm364_vm10, %v280_v49, -1e+30  ;;  %v252_v1 = vmul.f32 2.0, %v190_v0  ;;  %v260_v6 = vmul.f32 2.0, %v230_v4 }
  0xf3   :  { %v388_v50 = vsel %vm356_vm9, 1e+30, %v272_v45  ;;  %v381_v8 = vsel %vm365_vm12, %v281_v3, -1e+30  ;;  %v396_v9 = vsel %vm364_vm10, 1e+30, %v280_v49  ;;  %v275_v17 = vsub.f32 %v1397_v59, %v253_v10 }
  0xf4   :  { %v274_v7 = vsub.f32 %v1397_v59, %v252_v1  ;;  %v282_v11 = vsub.f32 %v1397_v59, %v260_v6  ;;  %v397_v15 = vsel %vm365_vm12, 1e+30, %v281_v3  ;;  %v283_v20 = vsub.f32 %v1397_v59, %v261_v14  ;;  %v401_v59 = vld [vmem:[%s2447_s6 + $0x8] sm:$0xff]  ;;  %v489_v41 = vld [vmem:[%s2450_s7 + $0x40] sm:$0xff]  ;;  %v403_v0 = vld [vmem:[%s2447_s6 + $0x18] sm:$0xff] }
  0xf5   :  { %513 = vmin.xlane.f32.xlu1 %v392_v24  ;;  %416 = vmax.xlane.f32.xlu0 %v368_v25  ;;  %v375_v18 = vsel %vm359_vm15, %v275_v17, -1e+30  ;;  %v391_v23 = vsel %vm359_vm15, 1e+30, %v275_v17  ;;  %v565_v36 = vld [vmem:[%s2451_s2 + $0x8] sm:$0xff]  ;;  %v564_v1 = vld [vmem:[%s2451_s2] sm:$0xff] }
  0xf6   :  { %v374_v13 = vsel %vm358_vm13, %v274_v7, -1e+30  ;;  %v382_v16 = vsel %vm366_vm14, %v282_v11, -1e+30  ;;  %v390_v19 = vsel %vm358_vm13, 1e+30, %v274_v7 }
  0xf7   :  { %v383_v21 = vsel %vm367_vm1, %v283_v20, -1e+30  ;;  %v398_v22 = vsel %vm366_vm14, 1e+30, %v282_v11  ;;  %v399_v56 = vsel %vm367_vm1, 1e+30, %v283_v20 }
  0xf8   :  { %v411_v14 = vld [vmem:[%s2447_s6 + $0x58] sm:$0xff] }
  0xf9   :  { %436 = vmax.xlane.f32.xlu1 %v378_v31  ;;  %422 = vmax.xlane.f32.xlu0 %v371_v32 }
  0xfd   :  { %438 = vmax.xlane.f32.xlu0 %v379_v39  ;;  %501 = vmin.xlane.f32.xlu1 %v386_v40 }
 0x101   :  { %503 = vmin.xlane.f32.xlu0 %v387_v43  ;;  %517 = vmin.xlane.f32.xlu1 %v394_v44  ;;  %v400_v44 = vld [vmem:[%s2447_s6] sm:$0xff] }
 0x105   :  { %519 = vmin.xlane.f32.xlu0 %v395_v47  ;;  %424 = vmax.xlane.f32.xlu1 %v372_v48 }
 0x109   :  { %420 = vmax.xlane.f32.xlu0 %v370_v57  ;;  %440 = vmax.xlane.f32.xlu1 %v380_v58  ;;  %v410_v58 = vld [vmem:[%s2447_s6 + $0x50] sm:$0xff] }
 0x10d   :  { %426 = vmax.xlane.f32.xlu0 %v373_v2  ;;  %505 = vmin.xlane.f32.xlu1 %v388_v50 }
 0x111   :  { %442 = vmax.xlane.f32.xlu0 %v381_v8  ;;  %521 = vmin.xlane.f32.xlu1 %v396_v9 }
 0x115   :  { %507 = vmin.xlane.f32.xlu0 %v389_v12  ;;  %428 = vmax.xlane.f32.xlu1 %v374_v13 }
 0x119   :  { %523 = vmin.xlane.f32.xlu0 %v397_v15  ;;  %444 = vmax.xlane.f32.xlu1 %v382_v16  ;;  %v483_v15 = vld [vmem:[%s2450_s7 + $0x10] sm:$0xff] }
 0x11d   :  { %430 = vmax.xlane.f32.xlu0 %v375_v18  ;;  %509 = vmin.xlane.f32.xlu1 %v390_v19 }
 0x121   :  { %446 = vmax.xlane.f32.xlu0 %v383_v21  ;;  %525 = vmin.xlane.f32.xlu1 %v398_v22  ;;  %v1693_v21 = vld [vmem:[%s2451_s2 + $0x50] sm:$0xff] }
 0x125   :  { %511 = vmin.xlane.f32.xlu0 %v391_v23 }
 0x129   :  { %527 = vmin.xlane.f32.xlu0 %v399_v56 }
 0x172   :  { %v435_v24 = vpop.xlane.xlu0 %434  ;;  %v419_v25 = vpop.xlane.xlu1 %418 }
 0x173   :  { %v457_v26 = vmax.f32 %v409_v61, %v435_v24  ;;  %v449_v27 = vmax.f32 %v401_v59, %v419_v25  ;;  %v1699_v59 = vld [vmem:[%s2451_s2 + $0x18] sm:$0xff]  ;;  %v491_v25 = vld [vmem:[%s2450_s7 + $0x50] sm:$0xff] }
 0x174   :  { %v484_v24 = vld [vmem:[%s2450_s7 + $0x18] sm:$0xff] }
 0x175   :  { %474 = vst.msk [vmem:[%s2447_s6 + $0x48] sm:$0xff] %vm29_vm0, %v457_v26  ;;  %466 = vst.msk [vmem:[%s2447_s6 + $0x8] sm:$0xff] %vm29_vm0, %v449_v27 }
 0x176   :  { %v500_v29 = vpop.xlane.xlu0 %499  ;;  %v433_v30 = vpop.xlane.xlu1 %432 }
 0x177   :  { %v530_v31 = vmin.f32 %v482_v60, %v500_v29  ;;  %v456_v32 = vmax.f32 %v408_v28, %v433_v30 }
 0x179   :  { %546 = vst.msk [vmem:[%s2450_s7 + $0x8] sm:$0xff] %vm29_vm0, %v530_v31  ;;  %473 = vst.msk [vmem:[%s2447_s6 + $0x40] sm:$0xff] %vm29_vm0, %v456_v32 }
 0x17a   :  { %v516_v37 = vpop.xlane.xlu0 %515  ;;  %v498_v38 = vpop.xlane.xlu1 %497 }
 0x17b   :  { %v538_v39 = vmin.f32 %v490_v33, %v516_v37  ;;  %v529_v40 = vmin.f32 %v481_v34, %v498_v38 }
 0x17c   :  { %v589_v42 = vld [vmem:[%s2447_s6 + $0x48] sm:$0xff] }
 0x17d   :  { %v581_v43 = vld [vmem:[%s2447_s6 + $0x8] sm:$0xff]  ;;  %v605_v45 = vadd.f32 %v589_v42, %v573_v35  ;;  %554 = vst.msk [vmem:[%s2450_s7 + $0x48] sm:$0xff] %vm29_vm0, %v538_v39  ;;  %545 = vst.msk [vmem:[%s2450_s7] sm:$0xff] %vm29_vm0, %v529_v40  ;;  %v492_v39 = vld [vmem:[%s2450_s7 + $0x58] sm:$0xff] }
 0x17e   :  { %v597_v46 = vadd.f32 %v581_v43, %v565_v36  ;;  %v514_v47 = vpop.xlane.xlu1 %513  ;;  %v417_v48 = vpop.xlane.xlu0 %416 }
 0x17f   :  { %v1622_v49 = vmax.f32 %v605_v45, 1e-12  ;;  %v537_v53 = vmin.f32 %v489_v41, %v514_v47  ;;  %v448_v57 = vmax.f32 %v400_v44, %v417_v48  ;;  %v1762_v45 = vld [vmem:[%s2451_s2 + $0x58] sm:$0xff] }
 0x180   :  { %v1624_v51 = vmax.f32 %v597_v46, 1e-12  ;;  %v757_v62 = vld [vmem:[%s2450_s7 + $0x8] sm:$0xff]  ;;  %v588_v63 = vld [vmem:[%s2447_s6 + $0x40] sm:$0xff] }
 0x181   :  { %1069 = vrsqrt.f32 %v1622_v49  ;;  %553 = vst.msk [vmem:[%s2450_s7 + $0x40] sm:$0xff] %vm29_vm0, %v537_v53  ;;  %465 = vst.msk [vmem:[%s2447_s6] sm:$0xff] %vm29_vm0, %v448_v57  ;;  %v773_v3 = vadd.f32 %v757_v62, %v565_v36  ;;  %v604_v4 = vadd.f32 %v588_v63, %v572_v52  ;;  %vm693_vm2 = vcmp.eq.f32.partialorder %v1622_v49, inf  ;;  %v404_v57 = vld [vmem:[%s2447_s6 + $0x20] sm:$0xff] }
 0x182   :  { %1071 = vrsqrt.f32 %v1624_v51  ;;  %v437_v2 = vpop.xlane.xlu1 %436  ;;  %v423_v50 = vpop.xlane.xlu0 %422  ;;  %vm695_vm3 = vcmp.eq.f32.partialorder %v1622_v49, 0.0  ;;  %v696_v31 = vand.u32 2147483648, %v1622_v49  ;;  %vm637_vm4 = vcmp.eq.f32.partialorder %v1624_v51, inf }
 0x183   :  { %v458_v5 = vmax.f32 %v410_v58, %v437_v2  ;;  %v451_v6 = vmax.f32 %v403_v0, %v423_v50  ;;  %v1660_v9 = vmax.f32 %v773_v3, 1e-12  ;;  %v1662_v55 = vmax.f32 %v604_v4, 1e-12  ;;  %v412_v2 = vld [vmem:[%s2447_s6 + $0x60] sm:$0xff]  ;;  %v405_v3 = vld [vmem:[%s2447_s6 + $0x28] sm:$0xff] }
 0x184   :  { %v765_v7 = vld [vmem:[%s2450_s7 + $0x48] sm:$0xff]  ;;  %v756_v8 = vld [vmem:[%s2450_s7] sm:$0xff]  ;;  %vm639_vm5 = vcmp.eq.f32.partialorder %v1624_v51, 0.0  ;;  %v640_v41 = vand.u32 2147483648, %v1624_v51 }
 0x185   :  { %v781_v10 = vadd.f32 %v765_v7, %v573_v35  ;;  %v772_v11 = vadd.f32 %v756_v8, %v564_v1  ;;  %475 = vst.msk [vmem:[%s2447_s6 + $0x50] sm:$0xff] %vm29_vm0, %v458_v5  ;;  %468 = vst.msk [vmem:[%s2447_s6 + $0x18] sm:$0xff] %vm29_vm0, %v451_v6  ;;  %1073 = vrsqrt.f32 %v1660_v9  ;;  %vm813_vm6 = vcmp.eq.f32.partialorder %v1660_v9, inf }
 0x186   :  { %v439_v12 = vpop.xlane.xlu0 %438  ;;  %v502_v13 = vpop.xlane.xlu1 %501  ;;  %1075 = vrsqrt.f32 %v1662_v55  ;;  %vm815_vm7 = vcmp.eq.f32.partialorder %v1660_v9, 0.0  ;;  %v816_v43 = vand.u32 2147483648, %v1660_v9  ;;  %vm686_vm8 = vcmp.eq.f32.partialorder %v1662_v55, inf }
 0x187   :  { %v1686_v54 = vmax.f32 %v781_v10, 1e-12  ;;  %v1688_v18 = vmax.f32 %v772_v11, 1e-12  ;;  %v459_v22 = vmax.f32 %v411_v14, %v439_v12  ;;  %v531_v23 = vmin.f32 %v483_v15, %v502_v13 }
 0x188   :  { %v764_v16 = vld [vmem:[%s2450_s7 + $0x40] sm:$0xff]  ;;  %vm688_vm9 = vcmp.eq.f32.partialorder %v1662_v55, 0.0  ;;  %v689_v50 = vand.u32 2147483648, %v1662_v55 }
 0x189   :  { %v580_v17 = vld [vmem:[%s2447_s6] sm:$0xff]  ;;  %v780_v19 = vadd.f32 %v764_v16, %v572_v52  ;;  %1077 = vrsqrt.f32 %v1686_v54  ;;  %476 = vst.msk [vmem:[%s2447_s6 + $0x58] sm:$0xff] %vm29_vm0, %v459_v22  ;;  %547 = vst.msk [vmem:[%s2450_s7 + $0x10] sm:$0xff] %vm29_vm0, %v531_v23  ;;  %v1774_v52 = vld [vmem:[%s2451_s2 + $0x10] sm:$0xff]  ;;  %vm869_vm10 = vcmp.eq.f32.partialorder %v1686_v54, inf  ;;  %vm871_vm11 = vcmp.eq.f32.partialorder %v1686_v54, 0.0 }
 0x18a   :  { %v596_v20 = vadd.f32 %v580_v17, %v564_v1  ;;  %v504_v56 = vpop.xlane.xlu0 %503  ;;  %v518_v61 = vpop.xlane.xlu1 %517  ;;  %1079 = vrsqrt.f32 %v1688_v18  ;;  %v872_v6 = vand.u32 2147483648, %v1686_v54  ;;  %vm806_vm12 = vcmp.eq.f32.partialorder %v1688_v18, inf }
 0x18b   :  { %v1724_v60 = vmax.f32 %v780_v19, 1e-12  ;;  %v532_v33 = vmin.f32 %v484_v24, %v504_v56  ;;  %v539_v34 = vmin.f32 %v491_v25, %v518_v61  ;;  %vm808_vm13 = vcmp.eq.f32.partialorder %v1688_v18, 0.0 }
 0x18c   :  { %v590_v26 = vld [vmem:[%s2447_s6 + $0x50] sm:$0xff]  ;;  %v583_v27 = vld [vmem:[%s2447_s6 + $0x18] sm:$0xff]  ;;  %v1726_v28 = vmax.f32 %v596_v20, 1e-12 }
 0x18d   :  { %v606_v29 = vadd.f32 %v590_v26, %v1693_v21  ;;  %v599_v32 = vadd.f32 %v583_v27, %v1699_v59  ;;  %1081 = vrsqrt.f32 %v1724_v60  ;;  %548 = vst.msk [vmem:[%s2450_s7 + $0x18] sm:$0xff] %vm29_vm0, %v532_v33  ;;  %555 = vst.msk [vmem:[%s2450_s7 + $0x50] sm:$0xff] %vm29_vm0, %v539_v34  ;;  %vm862_vm14 = vcmp.eq.f32.partialorder %v1724_v60, inf }
 0x18e   :  { %v1070_v30 = vpop.eup %1069  ;;  %v520_v35 = vpop.xlane.xlu0 %519  ;;  %1083 = vrsqrt.f32 %v1726_v28  ;;  %vm864_vm15 = vcmp.eq.f32.partialorder %v1724_v60, 0.0  ;;  %v865_v33 = vand.u32 2147483648, %v1724_v60  ;;  %vm630_vm1 = vcmp.eq.f32.partialorder %v1726_v28, inf }
 0x18f   :  { %v1731_v36 = vpop.xlane.xlu1 %424  ;;  %v1072_v37 = vpop.eup %1071  ;;  %v692_v38 = vmul.f32 %v1070_v30, %v1622_v49  ;;  %v1757_v44 = vmax.f32 %v606_v29, 1e-12  ;;  %v1769_v48 = vmax.f32 %v599_v32, 1e-12  ;;  %v540_v53 = vmin.f32 %v492_v39, %v520_v35  ;;  %v485_v29 = vld [vmem:[%s2450_s7 + $0x20] sm:$0xff] }
 0x190   :  { %v636_v40 = vmul.f32 %v1072_v37, %v1624_v51  ;;  %v591_v0 = vld [vmem:[%s2447_s6 + $0x58] sm:$0xff]  ;;  %v758_v1 = vld [vmem:[%s2450_s7 + $0x10] sm:$0xff]  ;;  %v452_v11 = vmax.f32 %v404_v57, %v1731_v36 }
 0x191   :  { %v694_v42 = vsel %vm693_vm2, %v1622_v49, %v692_v38  ;;  %v402_v49 = vld [vmem:[%s2447_s6 + $0x10] sm:$0xff]  ;;  %1085 = vrsqrt.f32 %v1757_v44  ;;  %556 = vst.msk [vmem:[%s2450_s7 + $0x58] sm:$0xff] %vm29_vm0, %v540_v53  ;;  %v607_v7 = vadd.f32 %v591_v0, %v1762_v45  ;;  %v774_v8 = vadd.f32 %v758_v1, %v1774_v52 }
 0x192   :  { %v697_v46 = vsel %vm695_vm3, %v696_v31, %v694_v42  ;;  %v638_v47 = vsel %vm637_vm4, %v1624_v51, %v636_v40  ;;  %v421_v58 = vpop.xlane.xlu0 %420  ;;  %v1074_v51 = vpop.eup %1073  ;;  %1087 = vrsqrt.f32 %v1769_v48  ;;  %469 = vst.msk [vmem:[%s2447_s6 + $0x20] sm:$0xff] %vm29_vm0, %v452_v11  ;;  %vm632_vm2 = vcmp.eq.f32.partialorder %v1726_v28, 0.0 }
 0x193   :  { %v441_v62 = vpop.xlane.xlu1 %440  ;;  %749 = vst.msk [vmem:[%s2447_s6 + $0x48] sm:$0xff] %vm29_vm0, %v697_v46  ;;  %v641_v63 = vsel %vm639_vm5, %v640_v41, %v638_v47  ;;  %v1076_v4 = vpop.eup %1075  ;;  %v812_v5 = vmul.f32 %v1074_v51, %v1660_v9  ;;  %v450_v12 = vmax.f32 %v402_v49, %v421_v58  ;;  %v1826_v17 = vmax.f32 %v607_v7, 1e-12  ;;  %v1931_v47 = vld [vmem:[%s2451_s2 + $0x28] sm:$0xff] }
 0x194   :  { %741 = vst.msk [vmem:[%s2447_s6 + $0x8] sm:$0xff] %vm29_vm0, %v641_v63  ;;  %v685_v10 = vmul.f32 %v1076_v4, %v1662_v55  ;;  %v460_v13 = vmax.f32 %v412_v2, %v441_v62  ;;  %v1828_v19 = vmax.f32 %v774_v8, 1e-12  ;;  %v759_v20 = vld [vmem:[%s2450_s7 + $0x18] sm:$0xff]  ;;  %v766_v22 = vld [vmem:[%s2450_s7 + $0x50] sm:$0xff]  ;;  %v633_v58 = vand.u32 2147483648, %v1726_v28 }
 0x195   :  { %v814_v16 = vsel %vm813_vm6, %v1660_v9, %v812_v5  ;;  %v775_v25 = vadd.f32 %v759_v20, %v1699_v59  ;;  %v782_v26 = vadd.f32 %v766_v22, %v1693_v21  ;;  %467 = vst.msk [vmem:[%s2447_s6 + $0x10] sm:$0xff] %vm29_vm0, %v450_v12  ;;  %1089 = vrsqrt.f32 %v1826_v17 }
 0x196   :  { %v427_v14 = vpop.xlane.xlu0 %426  ;;  %v1078_v56 = vpop.eup %1077  ;;  %v817_v61 = vsel %vm815_vm7, %v816_v43, %v814_v16  ;;  %v687_v24 = vsel %vm686_vm8, %v1662_v55, %v685_v10  ;;  %477 = vst.msk [vmem:[%s2447_s6 + $0x60] sm:$0xff] %vm29_vm0, %v460_v13  ;;  %v809_v55 = vand.u32 2147483648, %v1688_v18  ;;  %1091 = vrsqrt.f32 %v1828_v19 }
 0x197   :  { %v1821_v15 = vpop.xlane.xlu1 %505  ;;  %v453_v23 = vmax.f32 %v405_v3, %v427_v14  ;;  %v1080_v9 = vpop.eup %1079  ;;  %917 = vst.msk [vmem:[%s2450_s7 + $0x8] sm:$0xff] %vm29_vm0, %v817_v61  ;;  %v690_v21 = vsel %vm688_vm9, %v689_v50, %v687_v24  ;;  %v868_v59 = vmul.f32 %v1078_v56, %v1686_v54  ;;  %v1897_v38 = vmax.f32 %v775_v25, 1e-12 }
 0x198   :  { %748 = vst.msk [vmem:[%s2447_s6 + $0x40] sm:$0xff] %vm29_vm0, %v690_v21  ;;  %v805_v27 = vmul.f32 %v1080_v9, %v1688_v18  ;;  %v767_v34 = vld [vmem:[%s2450_s7 + $0x58] sm:$0xff]  ;;  %v1899_v39 = vmax.f32 %v782_v26, 1e-12  ;;  %v533_v43 = vmin.f32 %v485_v29, %v1821_v15  ;;  %vm700_vm3 = vcmp.eq.f32.partialorder %v1757_v44, inf }
 0x199   :  { %470 = vst.msk [vmem:[%s2447_s6 + $0x28] sm:$0xff] %vm29_vm0, %v453_v23  ;;  %v870_v32 = vsel %vm869_vm10, %v1686_v54, %v868_v59  ;;  %v783_v42 = vadd.f32 %v767_v34, %v1762_v45  ;;  %1093 = vrsqrt.f32 %v1897_v38  ;;  %v1926_v45 = vld [vmem:[%s2451_s2 + $0x60] sm:$0xff]  ;;  %vm702_vm4 = vcmp.eq.f32.partialorder %v1757_v44, 0.0  ;;  %v406_v34 = vld [vmem:[%s2447_s6 + $0x30] sm:$0xff] }
 0x19a   :  { %v1879_v30 = vpop.xlane.xlu0 %442  ;;  %v1082_v35 = vpop.eup %1081  ;;  %v873_v36 = vsel %vm871_vm11, %v872_v6, %v870_v32  ;;  %v807_v37 = vsel %vm806_vm12, %v1688_v18, %v805_v27  ;;  %v1921_v18 = vld [vmem:[%s2451_s2 + $0x20] sm:$0xff]  ;;  %1095 = vrsqrt.f32 %v1899_v39  ;;  %549 = vst.msk [vmem:[%s2450_s7 + $0x20] sm:$0xff] %vm29_vm0, %v533_v43  ;;  %v703_v50 = vand.u32 2147483648, %v1757_v44 }
 0x19b   :  { %v1881_v31 = vpop.xlane.xlu1 %521  ;;  %v1084_v40 = vpop.eup %1083  ;;  %925 = vst.msk [vmem:[%s2450_s7 + $0x48] sm:$0xff] %vm29_vm0, %v873_v36  ;;  %v810_v41 = vsel %vm808_vm13, %v809_v55, %v807_v37  ;;  %v861_v54 = vmul.f32 %v1082_v35, %v1724_v60  ;;  %v584_v62 = vld [vmem:[%s2447_s6 + $0x20] sm:$0xff]  ;;  %v1973_v6 = vmax.f32 %v783_v42, 1e-12  ;;  %vm651_vm5 = vcmp.eq.f32.partialorder %v1769_v48, inf  ;;  %v413_v55 = vld [vmem:[%s2447_s6 + $0x68] sm:$0xff] }
 0x19c   :  { %916 = vst.msk [vmem:[%s2450_s7] sm:$0xff] %vm29_vm0, %v810_v41  ;;  %v629_v46 = vmul.f32 %v1084_v40, %v1726_v28  ;;  %v582_v63 = vld [vmem:[%s2447_s6 + $0x10] sm:$0xff]  ;;  %v600_v7 = vadd.f32 %v584_v62, %v1921_v18  ;;  %v654_v15 = vand.u32 2147483648, %v1769_v48  ;;  %vm653_vm6 = vcmp.eq.f32.partialorder %v1769_v48, 0.0  ;;  %v493_v32 = vld [vmem:[%s2450_s7 + $0x60] sm:$0xff]  ;;  %v494_v40 = vld [vmem:[%s2450_s7 + $0x68] sm:$0xff] }
 0x19d   :  { %v863_v49 = vsel %vm862_vm14, %v1724_v60, %v861_v54  ;;  %v592_v0 = vld [vmem:[%s2447_s6 + $0x60] sm:$0xff]  ;;  %v598_v10 = vadd.f32 %v582_v63, %v1774_v52  ;;  %1097 = vrsqrt.f32 %v1973_v6  ;;  %vm707_vm7 = vcmp.eq.f32.partialorder %v1826_v17, inf  ;;  %v414_v41 = vld [vmem:[%s2447_s6 + $0x70] sm:$0xff]  ;;  %v415_v63 = vld [vmem:[%s2447_s6 + $0x78] sm:$0xff] }
 0x19e   :  { %v1933_v53 = vpop.xlane.xlu0 %507  ;;  %v1086_v1 = vpop.eup %1085  ;;  %v866_v2 = vsel %vm864_vm15, %v865_v33, %v863_v49  ;;  %v631_v51 = vsel %vm630_vm1, %v1726_v28, %v629_v46  ;;  %v608_v11 = vadd.f32 %v592_v0, %v1926_v45  ;;  %v1998_v20 = vmax.f32 %v600_v7, 1e-12  ;;  %v486_v33 = vld [vmem:[%s2450_s7 + $0x28] sm:$0xff]  ;;  %v487_v62 = vld [vmem:[%s2450_s7 + $0x30] sm:$0xff]  ;;  %v488_v7 = vld [vmem:[%s2450_s7 + $0x38] sm:$0xff] }
 0x19f   :  { %v1935_v57 = vpop.xlane.xlu1 %428  ;;  %v1088_v4 = vpop.eup %1087  ;;  %924 = vst.msk [vmem:[%s2450_s7 + $0x40] sm:$0xff] %vm29_vm0, %v866_v2  ;;  %v634_v60 = vsel %vm632_vm2, %v633_v58, %v631_v51  ;;  %v699_v5 = vmul.f32 %v1086_v1, %v1757_v44  ;;  %v2004_v23 = vmax.f32 %v598_v10, 1e-12  ;;  %vm709_vm8 = vcmp.eq.f32.partialorder %v1826_v17, 0.0  ;;  %v407_v58 = vld [vmem:[%s2447_s6 + $0x38] sm:$0xff] }
 0x1a0   :  { %v585_v3 = vld [vmem:[%s2447_s6 + $0x28] sm:$0xff]  ;;  %740 = vst.msk [vmem:[%s2447_s6] sm:$0xff] %vm29_vm0, %v634_v60  ;;  %v650_v8 = vmul.f32 %v1088_v4, %v1769_v48  ;;  %v2006_v56 = vmax.f32 %v608_v11, 1e-12  ;;  %1099 = vrsqrt.f32 %v1998_v20  ;;  %v710_v26 = vand.u32 2147483648, %v1826_v17 }
 0x1a1   :  { %v601_v28 = vadd.f32 %v585_v3, %v1931_v47  ;;  %v701_v14 = vsel %vm700_vm3, %v1757_v44, %v699_v5  ;;  %vm820_vm9 = vcmp.eq.f32.partialorder %v1828_v19, inf  ;;  %1101 = vrsqrt.f32 %v2004_v23  ;;  %v760_v27 = vld [vmem:[%s2450_s7 + $0x20] sm:$0xff] }
 0x1a2   :  { %v1984_v12 = vpop.xlane.xlu0 %523  ;;  %v704_v52 = vsel %vm702_vm4, %v703_v50, %v701_v14  ;;  %v652_v16 = vsel %vm651_vm5, %v1769_v48, %v650_v8  ;;  %v1090_v44 = vpop.eup %1089  ;;  %vm822_vm10 = vcmp.eq.f32.partialorder %v1828_v19, 0.0  ;;  %v823_v59 = vand.u32 2147483648, %v1828_v19 }
 0x1a3   :  { %v1986_v13 = vpop.xlane.xlu1 %444  ;;  %750 = vst.msk [vmem:[%s2447_s6 + $0x50] sm:$0xff] %vm29_vm0, %v704_v52  ;;  %v655_v22 = vsel %vm653_vm6, %v654_v15, %v652_v16  ;;  %v2008_v61 = vmax.f32 %v601_v28, 1e-12  ;;  %v1092_v24 = vpop.eup %1091  ;;  %v706_v25 = vmul.f32 %v1090_v44, %v1826_v17  ;;  %1103 = vrsqrt.f32 %v2006_v56  ;;  %v577_v16 = vld [vmem:[%s2451_s2 + $0x68] sm:$0xff] }
 0x1a4   :  { %743 = vst.msk [vmem:[%s2447_s6 + $0x18] sm:$0xff] %vm29_vm0, %v655_v22  ;;  %v819_v21 = vmul.f32 %v1092_v24, %v1828_v19  ;;  %vm827_vm11 = vcmp.eq.f32.partialorder %v1897_v38, inf  ;;  %vm829_vm12 = vcmp.eq.f32.partialorder %v1897_v38, 0.0  ;;  %v830_v37 = vand.u32 2147483648, %v1897_v38 }
 0x1a5   :  { %v708_v29 = vsel %vm707_vm7, %v1826_v17, %v706_v25  ;;  %1105 = vrsqrt.f32 %v2008_v61  ;;  %vm876_vm13 = vcmp.eq.f32.partialorder %v1899_v39, inf  ;;  %v879_v43 = vand.u32 2147483648, %v1899_v39 }
 0x1a6   :  { %v2017_v48 = vpop.xlane.xlu0 %430  ;;  %v711_v35 = vsel %vm709_vm8, %v710_v26, %v708_v29  ;;  %v821_v36 = vsel %vm820_vm9, %v1828_v19, %v819_v21  ;;  %v1094_v42 = vpop.eup %1093  ;;  %v776_v46 = vadd.f32 %v760_v27, %v1921_v18  ;;  %v461_v49 = vmax.f32 %v413_v55, %v1879_v30 }
 0x1a7   :  { %v2023_v9 = vpop.xlane.xlu1 %509  ;;  %751 = vst.msk [vmem:[%s2447_s6 + $0x58] sm:$0xff] %vm29_vm0, %v711_v35  ;;  %v824_v17 = vsel %vm822_vm10, %v823_v59, %v821_v36  ;;  %v1096_v19 = vpop.eup %1095  ;;  %v826_v30 = vmul.f32 %v1094_v42, %v1897_v38  ;;  %v541_v18 = vmin.f32 %v493_v32, %v1881_v31  ;;  %v534_v0 = vmin.f32 %v486_v33, %v1933_v53  ;;  %v495_v31 = vld [vmem:[%s2450_s7 + $0x70] sm:$0xff] }
 0x1a8   :  { %918 = vst.msk [vmem:[%s2450_s7 + $0x10] sm:$0xff] %vm29_vm0, %v824_v17  ;;  %v454_v1 = vmax.f32 %v406_v34, %v1935_v57  ;;  %v875_v2 = vmul.f32 %v1096_v19, %v1899_v39  ;;  %v2090_v51 = vmax.f32 %v776_v46, 1e-12  ;;  %478 = vst.msk [vmem:[%s2447_s6 + $0x68] sm:$0xff] %vm29_vm0, %v461_v49  ;;  %v542_v50 = vmin.f32 %v494_v40, %v1984_v12  ;;  %v496_v12 = vld [vmem:[%s2450_s7 + $0x78] sm:$0xff]  ;;  %v570_v49 = vld [vmem:[%s2451_s2 + $0x30] sm:$0xff] }
 0x1a9   :  { %v462_v3 = vmax.f32 %v414_v41, %v1986_v13  ;;  %v828_v57 = vsel %vm827_vm11, %v1897_v38, %v826_v30  ;;  %557 = vst.msk [vmem:[%s2450_s7 + $0x60] sm:$0xff] %vm29_vm0, %v541_v18  ;;  %550 = vst.msk [vmem:[%s2450_s7 + $0x28] sm:$0xff] %vm29_vm0, %v534_v0  ;;  %v455_v4 = vmax.f32 %v407_v58, %v2017_v48  ;;  %vm878_vm14 = vcmp.eq.f32.partialorder %v1899_v39, 0.0 }
 0x1aa   :  { %v447_v54 = vpop.xlane.xlu0 %446  ;;  %471 = vst.msk [vmem:[%s2447_s6 + $0x30] sm:$0xff] %vm29_vm0, %v454_v1  ;;  %v535_v60 = vmin.f32 %v487_v62, %v2023_v9  ;;  %v831_v10 = vsel %vm829_vm12, %v830_v37, %v828_v57  ;;  %v877_v11 = vsel %vm876_vm13, %v1899_v39, %v875_v2  ;;  %1107 = vrsqrt.f32 %v2090_v51  ;;  %558 = vst.msk [vmem:[%s2450_s7 + $0x68] sm:$0xff] %vm29_vm0, %v542_v50  ;;  %v1098_v38 = vpop.eup %1097  ;;  %v579_v57 = vld [vmem:[%s2451_s2 + $0x78] sm:$0xff] }
 0x1ab   :  { %v526_v53 = vpop.xlane.xlu1 %525  ;;  %v463_v5 = vmax.f32 %v415_v63, %v447_v54  ;;  %479 = vst.msk [vmem:[%s2447_s6 + $0x70] sm:$0xff] %vm29_vm0, %v462_v3  ;;  %919 = vst.msk [vmem:[%s2450_s7 + $0x18] sm:$0xff] %vm29_vm0, %v831_v10  ;;  %v880_v28 = vsel %vm878_vm14, %v879_v43, %v877_v11  ;;  %vm883_vm15 = vcmp.eq.f32.partialorder %v1973_v6, inf  ;;  %vm885_vm1 = vcmp.eq.f32.partialorder %v1973_v6, 0.0  ;;  %v578_v63 = vld [vmem:[%s2451_s2 + $0x70] sm:$0xff] }
 0x1ac   :  { %472 = vst.msk [vmem:[%s2447_s6 + $0x38] sm:$0xff] %vm29_vm0, %v455_v4  ;;  %551 = vst.msk [vmem:[%s2450_s7 + $0x30] sm:$0xff] %vm29_vm0, %v535_v60  ;;  %v543_v39 = vmin.f32 %v495_v31, %v526_v53  ;;  %v882_v13 = vmul.f32 %v1098_v38, %v1973_v6  ;;  %v886_v14 = vand.u32 2147483648, %v1973_v6  ;;  %vm658_vm2 = vcmp.eq.f32.partialorder %v1998_v20, inf }
 0x1ad   :  { %480 = vst.msk [vmem:[%s2447_s6 + $0x78] sm:$0xff] %vm29_vm0, %v463_v5  ;;  %926 = vst.msk [vmem:[%s2450_s7 + $0x50] sm:$0xff] %vm29_vm0, %v880_v28  ;;  %vm660_vm3 = vcmp.eq.f32.partialorder %v1998_v20, 0.0  ;;  %v661_v52 = vand.u32 2147483648, %v1998_v20  ;;  %vm644_vm4 = vcmp.eq.f32.partialorder %v2004_v23, inf  ;;  %vm646_vm5 = vcmp.eq.f32.partialorder %v2004_v23, 0.0  ;;  %v1100_v44 = vpop.eup %1099 }
 0x1ae   :  { %v512_v8 = vpop.xlane.xlu0 %511  ;;  %559 = vst.msk [vmem:[%s2450_s7 + $0x70] sm:$0xff] %vm29_vm0, %v543_v39  ;;  %v884_v48 = vsel %vm883_vm15, %v1973_v6, %v882_v13  ;;  %v647_v24 = vand.u32 2147483648, %v2004_v23  ;;  %vm714_vm6 = vcmp.eq.f32.partialorder %v2006_v56, inf  ;;  %v1102_v26 = vpop.eup %1101  ;;  %v657_v21 = vmul.f32 %v1100_v44, %v1998_v20 }
 0x1af   :  { %v536_v15 = vmin.f32 %v488_v7, %v512_v8  ;;  %v887_v9 = vsel %vm885_vm1, %v886_v14, %v884_v48  ;;  %vm716_vm7 = vcmp.eq.f32.partialorder %v2006_v56, 0.0  ;;  %v717_v59 = vand.u32 2147483648, %v2006_v56  ;;  %v593_v27 = vld [vmem:[%s2447_s6 + $0x68] sm:$0xff] }
 0x1b0   :  { %v1104_v55 = vpop.eup %1103  ;;  %927 = vst.msk [vmem:[%s2450_s7 + $0x58] sm:$0xff] %vm29_vm0, %v887_v9  ;;  %v643_v29 = vmul.f32 %v1102_v26, %v2004_v23  ;;  %vm665_vm8 = vcmp.eq.f32.partialorder %v2008_v61, inf  ;;  %v668_v6 = vand.u32 2147483648, %v2008_v61  ;;  %v609_v32 = vadd.f32 %v593_v27, %v577_v16  ;;  %v768_v33 = vld [vmem:[%s2450_s7 + $0x60] sm:$0xff]  ;;  %v761_v34 = vld [vmem:[%s2450_s7 + $0x28] sm:$0xff] }
 0x1b1   :  { %552 = vst.msk [vmem:[%s2450_s7 + $0x38] sm:$0xff] %vm29_vm0, %v536_v15  ;;  %v659_v36 = vsel %vm658_vm2, %v1998_v20, %v657_v21  ;;  %v713_v37 = vmul.f32 %v1104_v55, %v2006_v56  ;;  %v784_v40 = vadd.f32 %v768_v33, %v1926_v45  ;;  %v777_v41 = vadd.f32 %v761_v34, %v1931_v47  ;;  %v586_v62 = vld [vmem:[%s2447_s6 + $0x30] sm:$0xff]  ;;  %v769_v19 = vld [vmem:[%s2450_s7 + $0x68] sm:$0xff] }
 0x1b2   :  { %v528_v22 = vpop.xlane.xlu0 %527  ;;  %v1106_v35 = vpop.eup %1105  ;;  %v662_v54 = vsel %vm660_vm3, %v661_v52, %v659_v36  ;;  %v645_v42 = vsel %vm644_vm4, %v2004_v23, %v643_v29  ;;  %v2221_v43 = vmax.f32 %v609_v32, 1e-12  ;;  %vm667_vm9 = vcmp.eq.f32.partialorder %v2008_v61, 0.0  ;;  %v594_v30 = vld [vmem:[%s2447_s6 + $0x70] sm:$0xff] }
 0x1b3   :  { %v544_v25 = vmin.f32 %v496_v12, %v528_v22  ;;  %v664_v17 = vmul.f32 %v1106_v35, %v2008_v61  ;;  %744 = vst.msk [vmem:[%s2447_s6 + $0x20] sm:$0xff] %vm29_vm0, %v662_v54  ;;  %v648_v45 = vsel %vm646_vm5, %v647_v24, %v645_v42  ;;  %v715_v47 = vsel %vm714_vm6, %v2006_v56, %v713_v37  ;;  %v571_v56 = vld [vmem:[%s2451_s2 + $0x38] sm:$0xff]  ;;  %v762_v53 = vld [vmem:[%s2450_s7 + $0x30] sm:$0xff] }
 0x1b4   :  { %v2232_v20 = vmax.f32 %v784_v40, 1e-12  ;;  %v2234_v46 = vmax.f32 %v777_v41, 1e-12  ;;  %742 = vst.msk [vmem:[%s2447_s6 + $0x10] sm:$0xff] %vm29_vm0, %v648_v45  ;;  %v718_v23 = vsel %vm716_vm7, %v717_v59, %v715_v47  ;;  %1109 = vrsqrt.f32 %v2221_v43  ;;  %v587_v18 = vld [vmem:[%s2447_s6 + $0x38] sm:$0xff] }
 0x1b5   :  { %560 = vst.msk [vmem:[%s2450_s7 + $0x78] sm:$0xff] %vm29_vm0, %v544_v25  ;;  %v666_v58 = vsel %vm665_vm8, %v2008_v61, %v664_v17  ;;  %752 = vst.msk [vmem:[%s2447_s6 + $0x60] sm:$0xff] %vm29_vm0, %v718_v23  ;;  %v602_v1 = vadd.f32 %v586_v62, %v570_v49  ;;  %v785_v50 = vadd.f32 %v769_v19, %v577_v16  ;;  %v595_v4 = vld [vmem:[%s2447_s6 + $0x78] sm:$0xff]  ;;  %vm834_vm10 = vcmp.eq.f32.partialorder %v2090_v51, inf  ;;  %v770_v7 = vld [vmem:[%s2450_s7 + $0x70] sm:$0xff] }
 0x1b6   :  { %v669_v61 = vsel %vm667_vm9, %v668_v6, %v666_v58  ;;  %1111 = vrsqrt.f32 %v2232_v20  ;;  %v610_v3 = vadd.f32 %v594_v30, %v578_v63  ;;  %v603_v31 = vadd.f32 %v587_v18, %v571_v56 }
 0x1b7   :  { %745 = vst.msk [vmem:[%s2447_s6 + $0x28] sm:$0xff] %vm29_vm0, %v669_v61  ;;  %1113 = vrsqrt.f32 %v2234_v46  ;;  %v1108_v0 = vpop.eup %1107  ;;  %vm836_vm11 = vcmp.eq.f32.partialorder %v2090_v51, 0.0  ;;  %v837_v60 = vand.u32 2147483648, %v2090_v51  ;;  %v2291_v5 = vmax.f32 %v602_v1, 1e-12 }
 0x1b8   :  { %v833_v2 = vmul.f32 %v1108_v0, %v2090_v51  ;;  %v2297_v10 = vmax.f32 %v785_v50, 1e-12  ;;  %v2299_v11 = vmax.f32 %v610_v3, 1e-12  ;;  %v2301_v38 = vmax.f32 %v603_v31, 1e-12 }
 0x1b9   :  { %1115 = vrsqrt.f32 %v2291_v5  ;;  %v778_v39 = vadd.f32 %v762_v53, %v570_v49  ;;  %v611_v12 = vadd.f32 %v595_v4, %v579_v57  ;;  %v786_v13 = vadd.f32 %v770_v7, %v578_v63 }
 0x1ba   :  { %v835_v8 = vsel %vm834_vm10, %v2090_v51, %v833_v2  ;;  %1117 = vrsqrt.f32 %v2297_v10  ;;  %v763_v51 = vld [vmem:[%s2450_s7 + $0x38] sm:$0xff]  ;;  %vm721_vm12 = vcmp.eq.f32.partialorder %v2221_v43, inf  ;;  %vm723_vm13 = vcmp.eq.f32.partialorder %v2221_v43, 0.0 }
 0x1bb   :  { %v838_v28 = vsel %vm836_vm11, %v837_v60, %v835_v8  ;;  %1119 = vrsqrt.f32 %v2299_v11  ;;  %v2317_v15 = vmax.f32 %v778_v39, 1e-12  ;;  %v2319_v52 = vmax.f32 %v611_v12, 1e-12 }
 0x1bc   :  { %920 = vst.msk [vmem:[%s2450_s7 + $0x20] sm:$0xff] %vm29_vm0, %v838_v28  ;;  %1121 = vrsqrt.f32 %v2301_v38  ;;  %v771_v14 = vld [vmem:[%s2450_s7 + $0x78] sm:$0xff]  ;;  %v2322_v16 = vmax.f32 %v786_v13, 1e-12  ;;  %v779_v44 = vadd.f32 %v763_v51, %v571_v56  ;;  %v724_v26 = vand.u32 2147483648, %v2221_v43 }
 0x1bd   :  { %1123 = vrsqrt.f32 %v2317_v15  ;;  %v787_v48 = vadd.f32 %v771_v14, %v579_v57  ;;  %vm890_vm14 = vcmp.eq.f32.partialorder %v2232_v20, inf  ;;  %vm892_vm15 = vcmp.eq.f32.partialorder %v2232_v20, 0.0 }
 0x1be   :  { %1125 = vrsqrt.f32 %v2319_v52  ;;  %v893_v59 = vand.u32 2147483648, %v2232_v20  ;;  %vm841_vm1 = vcmp.eq.f32.partialorder %v2234_v46, inf  ;;  %v844_v29 = vand.u32 2147483648, %v2234_v46 }
 0x1bf   :  { %1127 = vrsqrt.f32 %v2322_v16  ;;  %v2343_v33 = vmax.f32 %v779_v44, 1e-12  ;;  %v2345_v34 = vmax.f32 %v787_v48, 1e-12  ;;  %vm843_vm2 = vcmp.eq.f32.partialorder %v2234_v46, 0.0 }
 0x1c0   :  { %vm672_vm3 = vcmp.eq.f32.partialorder %v2291_v5, inf  ;;  %vm674_vm4 = vcmp.eq.f32.partialorder %v2291_v5, 0.0  ;;  %v675_v42 = vand.u32 2147483648, %v2291_v5  ;;  %vm897_vm5 = vcmp.eq.f32.partialorder %v2297_v10, inf }
 0x1c1   :  { %v1110_v22 = vpop.eup %1109  ;;  %1129 = vrsqrt.f32 %v2343_v33  ;;  %vm899_vm6 = vcmp.eq.f32.partialorder %v2297_v10, 0.0  ;;  %v900_v45 = vand.u32 2147483648, %v2297_v10  ;;  %vm728_vm7 = vcmp.eq.f32.partialorder %v2299_v11, inf }
 0x1c2   :  { %v720_v25 = vmul.f32 %v1110_v22, %v2221_v43  ;;  %1131 = vrsqrt.f32 %v2345_v34  ;;  %vm730_vm8 = vcmp.eq.f32.partialorder %v2299_v11, 0.0  ;;  %v731_v58 = vand.u32 2147483648, %v2299_v11 }
 0x1c3   :  { %v1112_v24 = vpop.eup %1111  ;;  %vm679_vm9 = vcmp.eq.f32.partialorder %v2301_v38, inf  ;;  %v682_v61 = vand.u32 2147483648, %v2301_v38  ;;  %vm681_vm10 = vcmp.eq.f32.partialorder %v2301_v38, 0.0  ;;  %vm848_vm11 = vcmp.eq.f32.partialorder %v2317_v15, inf }
 0x1c4   :  { %v1114_v9 = vpop.eup %1113  ;;  %v889_v21 = vmul.f32 %v1112_v24, %v2232_v20  ;;  %v722_v27 = vsel %vm721_vm12, %v2221_v43, %v720_v25  ;;  %vm850_vm12 = vcmp.eq.f32.partialorder %v2317_v15, 0.0  ;;  %v851_v3 = vand.u32 2147483648, %v2317_v15 }
 0x1c5   :  { %v840_v55 = vmul.f32 %v1114_v9, %v2234_v46  ;;  %v725_v6 = vsel %vm723_vm13, %v724_v26, %v722_v27  ;;  %vm735_vm13 = vcmp.eq.f32.partialorder %v2319_v52, inf  ;;  %v738_v57 = vand.u32 2147483648, %v2319_v52 }
 0x1c6   :  { %v891_v32 = vsel %vm890_vm14, %v2232_v20, %v889_v21  ;;  %753 = vst.msk [vmem:[%s2447_s6 + $0x68] sm:$0xff] %vm29_vm0, %v725_v6  ;;  %v1116_v40 = vpop.eup %1115  ;;  %vm737_vm14 = vcmp.eq.f32.partialorder %v2319_v52, 0.0  ;;  %v907_v7 = vand.u32 2147483648, %v2322_v16  ;;  %v858_v12 = vand.u32 2147483648, %v2343_v33 }
 0x1c7   :  { %v894_v35 = vsel %vm892_vm15, %v893_v59, %v891_v32  ;;  %v842_v36 = vsel %vm841_vm1, %v2234_v46, %v840_v55  ;;  %v1118_v41 = vpop.eup %1117  ;;  %v671_v54 = vmul.f32 %v1116_v40, %v2291_v5  ;;  %vm904_vm15 = vcmp.eq.f32.partialorder %v2322_v16, inf }
 0x1c8   :  { %928 = vst.msk [vmem:[%s2450_s7 + $0x60] sm:$0xff] %vm29_vm0, %v894_v35  ;;  %v845_v37 = vsel %vm843_vm2, %v844_v29, %v842_v36  ;;  %v1120_v17 = vpop.eup %1119  ;;  %v896_v43 = vmul.f32 %v1118_v41, %v2297_v10  ;;  %vm906_vm1 = vcmp.eq.f32.partialorder %v2322_v16, 0.0  ;;  %vm855_vm2 = vcmp.eq.f32.partialorder %v2343_v33, inf }
 0x1c9   :  { %921 = vst.msk [vmem:[%s2450_s7 + $0x28] sm:$0xff] %vm29_vm0, %v845_v37  ;;  %v1122_v47 = vpop.eup %1121  ;;  %v673_v20 = vsel %vm672_vm3, %v2291_v5, %v671_v54  ;;  %v727_v46 = vmul.f32 %v1120_v17, %v2299_v11  ;;  %vm857_vm3 = vcmp.eq.f32.partialorder %v2343_v33, 0.0  ;;  %v914_v14 = vand.u32 2147483648, %v2345_v34 }
 0x1ca   :  { %v676_v49 = vsel %vm674_vm4, %v675_v42, %v673_v20  ;;  %v898_v23 = vsel %vm897_vm5, %v2297_v10, %v896_v43  ;;  %v678_v62 = vmul.f32 %v1122_v47, %v2301_v38  ;;  %v1124_v19 = vpop.eup %1123  ;;  %vm911_vm4 = vcmp.eq.f32.partialorder %v2345_v34, inf }
 0x1cb   :  { %746 = vst.msk [vmem:[%s2447_s6 + $0x30] sm:$0xff] %vm29_vm0, %v676_v49  ;;  %v901_v63 = vsel %vm899_vm6, %v900_v45, %v898_v23  ;;  %v729_v56 = vsel %vm728_vm7, %v2299_v11, %v727_v46  ;;  %v1126_v0 = vpop.eup %1125  ;;  %v847_v2 = vmul.f32 %v1124_v19, %v2317_v15  ;;  %vm913_vm5 = vcmp.eq.f32.partialorder %v2345_v34, 0.0 }
 0x1cc   :  { %929 = vst.msk [vmem:[%s2450_s7 + $0x68] sm:$0xff] %vm29_vm0, %v901_v63  ;;  %v732_v30 = vsel %vm730_vm8, %v731_v58, %v729_v56  ;;  %v680_v18 = vsel %vm679_vm9, %v2301_v38, %v678_v62  ;;  %v1128_v50 = vpop.eup %1127  ;;  %v734_v31 = vmul.f32 %v1126_v0, %v2319_v52 }
 0x1cd   :  { %754 = vst.msk [vmem:[%s2447_s6 + $0x70] sm:$0xff] %vm29_vm0, %v732_v30  ;;  %v683_v1 = vsel %vm681_vm10, %v682_v61, %v680_v18  ;;  %v849_v53 = vsel %vm848_vm11, %v2317_v15, %v847_v2  ;;  %v903_v4 = vmul.f32 %v1128_v50, %v2322_v16 }
 0x1ce   :  { %747 = vst.msk [vmem:[%s2447_s6 + $0x38] sm:$0xff] %vm29_vm0, %v683_v1  ;;  %v852_v60 = vsel %vm850_vm12, %v851_v3, %v849_v53  ;;  %v736_v5 = vsel %vm735_vm13, %v2319_v52, %v734_v31  ;;  %v1130_v11 = vpop.eup %1129 }
 0x1cf   :  { %922 = vst.msk [vmem:[%s2450_s7 + $0x30] sm:$0xff] %vm29_vm0, %v852_v60  ;;  %v739_v8 = vsel %vm737_vm14, %v738_v57, %v736_v5  ;;  %v905_v10 = vsel %vm904_vm15, %v2322_v16, %v903_v4  ;;  %v1132_v28 = vpop.eup %1131  ;;  %v854_v39 = vmul.f32 %v1130_v11, %v2343_v33 }
 0x1d0   :  { %755 = vst.msk [vmem:[%s2447_s6 + $0x78] sm:$0xff] %vm29_vm0, %v739_v8  ;;  %v908_v38 = vsel %vm906_vm1, %v907_v7, %v905_v10  ;;  %v910_v13 = vmul.f32 %v1132_v28, %v2345_v34 }
 0x1d1   :  { %930 = vst.msk [vmem:[%s2450_s7 + $0x70] sm:$0xff] %vm29_vm0, %v908_v38  ;;  %v856_v51 = vsel %vm855_vm2, %v2343_v33, %v854_v39 }
 0x1d2   :  { %v859_v15 = vsel %vm857_vm3, %v858_v12, %v856_v51  ;;  %v912_v52 = vsel %vm911_vm4, %v2345_v34, %v910_v13 }
 0x1d3   :  { %923 = vst.msk [vmem:[%s2450_s7 + $0x38] sm:$0xff] %vm29_vm0, %v859_v15  ;;  %v915_v16 = vsel %vm913_vm5, %v914_v14, %v912_v52 }
 0x1d4   :  { %931 = vst.msk [vmem:[%s2450_s7 + $0x78] sm:$0xff] %vm29_vm0, %v915_v16 }

</bundles_post_ra>
